<compile_context>
chip_gen: v7x
topology: tpu7x:2x2x1
jax: 0.10.0
libtpu: 0.0.40
codegen_flags: <defaults>
</compile_context>

<pallas_src>
import jax
import jax.numpy as jnp
import numpy as np
from jax.experimental import pallas as pl
from jax.experimental.pallas import tpu as pltpu

_MM_DTYPE = jnp.bfloat16   # MXU operand dtype; accumulation stays f32
_TIME_BLOCK = 8            # LSTM time steps per grid invocation
_NEG = -1e9                # bias for padded softmax columns


def _round_up(x, m):
    return (x + m - 1) // m * m


# ----------------------------------------------------------------------------
# LSTM cell step (shared by encoder / decoder kernels; traced in-kernel)
# ----------------------------------------------------------------------------
def _lstm_step(xg, h, c, whh_bf):
    """xg: list of 4 (B,H) f32 input projections (+bias); whh_bf: 4x (H,H) bf16."""
    hh = h.astype(_MM_DTYPE)
    g = [xg[k] + jnp.dot(hh, whh_bf[k], preferred_element_type=jnp.float32)
         for k in range(4)]
    i_g = jax.nn.sigmoid(g[0])
    f_g = jax.nn.sigmoid(g[1])
    c_t = jnp.tanh(g[2])
    o_g = jax.nn.sigmoid(g[3])
    c_new = f_g * c + i_g * c_t
    h_new = o_g * jnp.tanh(c_new)
    return h_new, c_new


# ----------------------------------------------------------------------------
# Encoder LSTM: returns only the final hidden state (pack_padded h_n).
# ----------------------------------------------------------------------------
def lstm_encode_pallas(x_tbe, w_ih, w_hh, bias, lengths, time_block=_TIME_BLOCK):
    T, B, E = x_tbe.shape
    H = w_hh.shape[-1]
    tb = time_block
    Tp = _round_up(T, tb)
    Bp = _round_up(B, 8)

    xp = jnp.pad(x_tbe.astype(jnp.float32), ((0, Tp - T), (0, Bp - B), (0, 0)))
    lens = jnp.pad(lengths.reshape(B, 1).astype(jnp.int32), ((0, Bp - B), (0, 0)))

    def kernel(len_ref, x_ref, wih_ref, whh_ref, b_ref, hlast_ref, h_st, c_st):
        bi = pl.program_id(0)
        nb = pl.num_programs(0)

        @pl.when(bi == 0)
        def _init():
            h_st[...] = jnp.zeros_like(h_st)
            c_st[...] = jnp.zeros_like(c_st)

        lens_v = len_ref[...]                       # (Bp, 1) int32
        t0 = bi * tb

        # Block-level input projections: one batched MXU matmul per gate.
        x2d = x_ref[...].reshape(tb * Bp, E).astype(_MM_DTYPE)
        whh = [whh_ref[k].astype(_MM_DTYPE) for k in range(4)]
        xproj = [jnp.dot(x2d, wih_ref[k].astype(_MM_DTYPE),
                         preferred_element_type=jnp.float32) + b_ref[k]
                 for k in range(4)]                 # each (tb*Bp, H) f32

        h = h_st[...]
        c = c_st[...]
        for tl in range(tb):                        # static unroll
            r0 = tl * Bp
            xg = [xproj[k][r0:r0 + Bp, :] for k in range(4)]
            h_new, c_new = _lstm_step(xg, h, c, whh)
            valid = lens_v > (t0 + tl)              # freeze past lengths[b]
            h = jnp.where(valid, h_new, h)
            c = jnp.where(valid, c_new, c)

        h_st[...] = h
        c_st[...] = c

        @pl.when(bi == nb - 1)                      # single (Bp,H) store
        def _final():
            hlast_ref[...] = h

    h_last = pl.pallas_call(
        kernel,
        out_shape=jax.ShapeDtypeStruct((Bp, H), jnp.float32),
        grid_spec=pltpu.PrefetchScalarGridSpec(
            num_scalar_prefetch=0,
            grid=(Tp // tb,),
            in_specs=[
                pl.BlockSpec((Bp, 1), lambda t: (0, 0)),
                pl.BlockSpec((tb, Bp, E), lambda t: (t, 0, 0)),
                pl.BlockSpec((4, E, H), lambda t: (0, 0, 0)),
                pl.BlockSpec((4, H, H), lambda t: (0, 0, 0)),
                pl.BlockSpec((4, 1, H), lambda t: (0, 0, 0)),
            ],
            out_specs=pl.BlockSpec((Bp, H), lambda t: (0, 0)),
            scratch_shapes=[pltpu.VMEM((Bp, H), jnp.float32),
                            pltpu.VMEM((Bp, H), jnp.float32)],
        ),
        compiler_params=pltpu.CompilerParams(
            dimension_semantics=("arbitrary",)),
    )(lens, xp, w_ih, w_hh, bias)
    return h_last[:B]


# ----------------------------------------------------------------------------
# Decoder LSTM with the fcout projection fused into the per-step epilogue.
# ----------------------------------------------------------------------------
def lstm_decode_fcout_pallas(x_tbe, w_ih, w_hh, bias, h0, c0, lengths,
                             w_out, b_out, time_block=_TIME_BLOCK):
    """Returns logits (B, T, V).  Hidden past lengths[b] is zeroed
    (pad_packed semantics), so padded-position logits equal the fcout bias --
    identical to applying fcout to the zero-padded decoder output."""
    T, B, E = x_tbe.shape
    H = w_hh.shape[-1]
    V = w_out.shape[1]
    tb = time_block
    Tp = _round_up(T, tb)
    Bp = _round_up(B, 8)
    Vp = _round_up(V, 128)      # lane-dense output block

    xp = jnp.pad(x_tbe.astype(jnp.float32), ((0, Tp - T), (0, Bp - B), (0, 0)))
    lens = jnp.pad(lengths.reshape(B, 1).astype(jnp.int32), ((0, Bp - B), (0, 0)))
    h0p = jnp.pad(h0.astype(jnp.float32), ((0, Bp - B), (0, 0)))
    c0p = jnp.pad(c0.astype(jnp.float32), ((0, Bp - B), (0, 0)))
    woutp = jnp.pad(w_out.astype(jnp.float32), ((0, 0), (0, Vp - V)))
    boutp = jnp.pad(b_out.reshape(1, V).astype(jnp.float32), ((0, 0), (0, Vp - V)))

    def kernel(len_ref, x_ref, wih_ref, whh_ref, b_ref, h0_ref, c0_ref,
               wout_ref, bout_ref, out_ref, h_st, c_st):
        bi = pl.program_id(0)

        @pl.when(bi == 0)
        def _init():
            h_st[...] = h0_ref[...]
            c_st[...] = c0_ref[...]

        lens_v = len_ref[...]
        t0 = bi * tb

        x2d = x_ref[...].reshape(tb * Bp, E).astype(_MM_DTYPE)
        whh = [whh_ref[k].astype(_MM_DTYPE) for k in range(4)]
        xproj = [jnp.dot(x2d, wih_ref[k].astype(_MM_DTYPE),
                         preferred_element_type=jnp.float32) + b_ref[k]
                 for k in range(4)]
        wout = wout_ref[...].astype(_MM_DTYPE)      # (H, Vp), loaded once/block
        bout = bout_ref[...]                        # (1, Vp)

        h = h_st[...]
        c = c_st[...]
        for tl in range(tb):                        # static unroll
            r0 = tl * Bp
            xg = [xproj[k][r0:r0 + Bp, :] for k in range(4)]
            h_new, c_new = _lstm_step(xg, h, c, whh)
            valid = lens_v > (t0 + tl)
            h_vis = jnp.where(valid, h_new, jnp.zeros_like(h_new))
            out_ref[tl] = jnp.dot(h_vis.astype(_MM_DTYPE), wout,
                                  preferred_element_type=jnp.float32) + bout
            h = jnp.where(valid, h_new, h)
            c = jnp.where(valid, c_new, c)

        h_st[...] = h
        c_st[...] = c

    out = pl.pallas_call(
        kernel,
        out_shape=jax.ShapeDtypeStruct((Tp, Bp, Vp), jnp.float32),
        grid_spec=pltpu.PrefetchScalarGridSpec(
            num_scalar_prefetch=0,
            grid=(Tp // tb,),
            in_specs=[
                pl.BlockSpec((Bp, 1), lambda t: (0, 0)),
                pl.BlockSpec((tb, Bp, E), lambda t: (t, 0, 0)),
                pl.BlockSpec((4, E, H), lambda t: (0, 0, 0)),
                pl.BlockSpec((4, H, H), lambda t: (0, 0, 0)),
                pl.BlockSpec((4, 1, H), lambda t: (0, 0, 0)),
                pl.BlockSpec((Bp, H), lambda t: (0, 0)),
                pl.BlockSpec((Bp, H), lambda t: (0, 0)),
                pl.BlockSpec((H, Vp), lambda t: (0, 0)),
                pl.BlockSpec((1, Vp), lambda t: (0, 0)),
            ],
            out_specs=pl.BlockSpec((tb, Bp, Vp), lambda t: (t, 0, 0)),
            scratch_shapes=[pltpu.VMEM((Bp, H), jnp.float32),
                            pltpu.VMEM((Bp, H), jnp.float32)],
        ),
        compiler_params=pltpu.CompilerParams(
            dimension_semantics=("arbitrary",)),
    )(lens, xp, w_ih, w_hh, bias, h0p, c0p, woutp, boutp)

    # Time-major -> batch-major (layout plumbing only).
    # TODO(synk): at very large vocab, tile Vp over a second grid axis and emit
    #             batch-major blocks directly to drop this wrapper transpose.
    return jnp.transpose(out[:T, :B, :V], (1, 0, 2))


# ----------------------------------------------------------------------------
# Tiled linear: y = act(x @ w + b), lane-dense (128-padded) output blocks.
# ----------------------------------------------------------------------------
def linear_pallas(x, w, b, act=None, block_m=256, block_n=512):
    M, K = x.shape
    N = w.shape[1]
    Mp = _round_up(M, 8)
    Np = _round_up(N, 128)
    bm = min(block_m, Mp)
    bn = min(block_n, Np)
    Mp = _round_up(Mp, bm)
    Np = _round_up(Np, bn)

    xp = jnp.pad(x.astype(jnp.float32), ((0, Mp - M), (0, 0)))
    wp = jnp.pad(w.astype(jnp.float32), ((0, 0), (0, Np - N)))
    bp = jnp.pad(b.astype(jnp.float32).reshape(1, N), ((0, 0), (0, Np - N)))

    def kernel(x_ref, w_ref, b_ref, o_ref):
        y = jnp.dot(x_ref[...].astype(_MM_DTYPE), w_ref[...].astype(_MM_DTYPE),
                    preferred_element_type=jnp.float32) + b_ref[...]
        if act == "tanh":
            y = jnp.tanh(y)
        elif act == "relu":
            y = jnp.maximum(y, 0.0)
        o_ref[...] = y

    out = pl.pallas_call(
        kernel,
        out_shape=jax.ShapeDtypeStruct((Mp, Np), jnp.float32),
        grid=(Mp // bm, Np // bn),
        in_specs=[pl.BlockSpec((bm, K), lambda i, j: (i, 0)),
                  pl.BlockSpec((K, bn), lambda i, j: (0, j)),
                  pl.BlockSpec((1, bn), lambda i, j: (0, j))],
        out_specs=pl.BlockSpec((bm, bn), lambda i, j: (i, j)),
        compiler_params=pltpu.CompilerParams(
            dimension_semantics=("parallel", "parallel")),
    )(xp, wp, bp)
    return out[:M, :N]


# ----------------------------------------------------------------------------
# Fused MLP head: log_softmax(w2 @ relu(w1 @ x + b1) + b2, axis=-1)
# ----------------------------------------------------------------------------
def mlp_logsoftmax_pallas(x, w1, b1, w2, b2, block_m=256):
    M, K = x.shape
    Hh = w1.shape[1]
    N = w2.shape[1]
    Mp = _round_up(M, 8)
    Np = _round_up(N, 128)
    bm = min(block_m, Mp)
    Mp = _round_up(Mp, bm)

    xp = jnp.pad(x.astype(jnp.float32), ((0, Mp - M), (0, 0)))
    b1r = b1.astype(jnp.float32).reshape(1, Hh)
    w2p = jnp.pad(w2.astype(jnp.float32), ((0, 0), (0, Np - N)))
    # Padded logit columns get a large negative bias so they vanish in softmax.
    b2p = jnp.pad(b2.astype(jnp.float32).reshape(1, N), ((0, 0), (0, Np - N)),
                  constant_values=_NEG)

    def kernel(x_ref, w1_ref, b1_ref, w2_ref, b2_ref, o_ref):
        h = jnp.dot(x_ref[...].astype(_MM_DTYPE), w1_ref[...].astype(_MM_DTYPE),
                    preferred_element_type=jnp.float32) + b1_ref[...]
        h = jnp.maximum(h, 0.0)
        logits = jnp.dot(h.astype(_MM_DTYPE), w2_ref[...].astype(_MM_DTYPE),
                         preferred_element_type=jnp.float32) + b2_ref[...]
        m = jnp.max(logits, axis=-1, keepdims=True)
        lse = jnp.log(jnp.sum(jnp.exp(logits - m), axis=-1, keepdims=True)) + m
        o_ref[...] = logits - lse

    out = pl.pallas_call(
        kernel,
        out_shape=jax.ShapeDtypeStruct((Mp, Np), jnp.float32),
        grid=(Mp // bm,),
        in_specs=[pl.BlockSpec((bm, K), lambda i: (i, 0)),
                  pl.BlockSpec((K, Hh), lambda i: (0, 0)),
                  pl.BlockSpec((1, Hh), lambda i: (0, 0)),
                  pl.BlockSpec((Hh, Np), lambda i: (0, 0)),
                  pl.BlockSpec((1, Np), lambda i: (0, 0))],
        out_specs=pl.BlockSpec((bm, Np), lambda i: (i, 0)),
        compiler_params=pltpu.CompilerParams(
            dimension_semantics=("parallel",)),
    )(xp, w1, b1r, w2p, b2p)
    return out[:M, :N]


# ----------------------------------------------------------------------------
# Parameter init (deterministic, PyTorch-default-style uniform / normal)
# ----------------------------------------------------------------------------
def _uniform(key, shape, bound):
    return jax.random.uniform(key, shape, jnp.float32, -bound, bound)


def init_params(key, vocab, num_classes, embed, y_embed, hidden, code):
    ks = iter(jax.random.split(key, 24))
    H = hidden
    p = {}
    p["embed"] = jax.random.normal(next(ks), (vocab, embed), jnp.float32)
    p["y_embed"] = jax.random.normal(next(ks), (num_classes, y_embed), jnp.float32)
    klstm = 1.0 / np.sqrt(H)
    # LSTM weights stored per-gate (gate, in, H), gate order i,f,g,o; combined
    # bias (b_ih+b_hh) is one uniform draw (same forward semantics).
    p["enc_wih"] = _uniform(next(ks), (4, embed, H), klstm)
    p["enc_whh"] = _uniform(next(ks), (4, H, H), klstm)
    p["enc_b"] = _uniform(next(ks), (4, 1, H), klstm)
    p["dec_wih"] = _uniform(next(ks), (4, embed, H), klstm)
    p["dec_whh"] = _uniform(next(ks), (4, H, H), klstm)
    p["dec_b"] = _uniform(next(ks), (4, 1, H), klstm)
    # fcmu and fclogvar fused into one (H+Y) -> 2*code projection.
    kin = 1.0 / np.sqrt(H + y_embed)
    p["fcmuvar_w"] = _uniform(next(ks), (H + y_embed, 2 * code), kin)
    p["fcmuvar_b"] = _uniform(next(ks), (2 * code,), kin)
    kz = 1.0 / np.sqrt(code + y_embed)
    p["fcz_w"] = _uniform(next(ks), (code + y_embed, 2 * H), kz)
    p["fcz_b"] = _uniform(next(ks), (2 * H,), kz)
    ko = 1.0 / np.sqrt(H)
    p["fcout_w"] = _uniform(next(ks), (H, vocab), ko)
    p["fcout_b"] = _uniform(next(ks), (vocab,), ko)
    p["cls_w1"] = _uniform(next(ks), (H, H), ko)
    p["cls_b1"] = _uniform(next(ks), (H,), ko)
    p["cls_w2"] = _uniform(next(ks), (H, num_classes), ko)
    p["cls_b2"] = _uniform(next(ks), (num_classes,), ko)
    p["bow_w1"] = _uniform(next(ks), (code + y_embed, H), kz)
    p["bow_b1"] = _uniform(next(ks), (H,), kz)
    p["bow_w2"] = _uniform(next(ks), (H, vocab), ko)
    p["bow_b2"] = _uniform(next(ks), (vocab,), ko)
    p["hidden"] = H
    p["code"] = code
    return p


# ----------------------------------------------------------------------------
# Full forward (glue: gathers / concats / slices; compute: Pallas kernels)
# ----------------------------------------------------------------------------
def sstext_vae_forward(params, inputs, lengths, y):
    """inputs (B,T) int32; lengths (B,) int32 (max == T); y (B,) int32.
    Eval-mode forward (dropout identity, z = mu)."""
    B, T = inputs.shape
    H = params["hidden"]
    C = params["code"]

    # Token embeddings gathered directly in time-major (T,B,E) order so both
    # LSTM kernels stream them without an extra (B,T,E) transpose copy.
    # TODO(synk): at production sizes move this gather into the LSTM kernels
    #             (scalar-prefetched token ids + pl.Element row gather).
    x_tbe = jnp.take(params["embed"], inputs.T, axis=0).astype(jnp.float32)
    lengths = lengths.astype(jnp.int32)

    # Encoder: only the final hidden state (pack_padded h_n); no h_all output.
    hn = lstm_encode_pallas(x_tbe, params["enc_wih"], params["enc_whh"],
                            params["enc_b"], lengths)                 # (B, H)

    # Classifier log-probs over classes.
    py = mlp_logsoftmax_pallas(hn, params["cls_w1"], params["cls_b1"],
                               params["cls_w2"], params["cls_b2"])    # (B, C)

    y_emb = jnp.take(params["y_embed"], y, axis=0)                    # (B, Y)
    h_cat = jnp.concatenate([hn, y_emb], axis=1)                      # (B, H+Y)

    # fcmu / fclogvar fused into a single matmul.
    muvar = linear_pallas(h_cat, params["fcmuvar_w"], params["fcmuvar_b"])
    mu, logvar = muvar[:, :C], muvar[:, C:]
    z = mu  # eval mode: no reparameterization noise

    code = jnp.concatenate([z, y_emb], axis=1)                        # (B, code+Y)

    # Decoder initial hidden: chunk(tanh(fcz(code)), 2)
    hz = linear_pallas(code, params["fcz_w"], params["fcz_b"], act="tanh")
    h0, c0 = hz[:, :H], hz[:, H:]

    # Decoder LSTM with fcout fused into its epilogue -> (B, T, V).
    outputs = lstm_decode_fcout_pallas(
        x_tbe, params["dec_wih"], params["dec_whh"], params["dec_b"],
        h0, c0, lengths, params["fcout_w"], params["fcout_b"])

    # TODO(synk): BoWPredictor is undefined in the reference; implemented as
    #             Linear->ReLU->Linear->log_softmax.
    bow = mlp_logsoftmax_pallas(code, params["bow_w1"], params["bow_b1"],
                                params["bow_w2"], params["bow_b2"])   # (B, V)

    # Match PyTorch's leading num_layers=1 dim on mu/logvar/bow.
    return outputs, mu[None], logvar[None], bow[None], py


# ----------------------------------------------------------------------------
if __name__ == "__main__":
    vocab_size, num_classes = 64, 4
    embed_size, y_embed_size = 16, 8
    hidden_size, code_size = 32, 16
    B, T = 2, 8

    key = jax.random.PRNGKey(0)
    kp, ki, ky = jax.random.split(key, 3)

    params = init_params(kp, vocab_size, num_classes, embed_size,
                         y_embed_size, hidden_size, code_size)

    inputs = jax.random.randint(ki, (B, T), 0, vocab_size, dtype=jnp.int32)
    lengths = jnp.array([8, 5], dtype=jnp.int32)  # descending, max == T
    y = jax.random.randint(ky, (B,), 0, num_classes, dtype=jnp.int32)

    outputs, mu, logvar, bow, py = sstext_vae_forward(params, inputs, lengths, y)
    jax.block_until_ready((outputs, mu, logvar, bow, py))

    assert outputs.shape == (B, T, vocab_size)
    assert mu.shape == (1, B, code_size)
    assert logvar.shape == (1, B, code_size)
    assert bow.shape == (1, B, vocab_size)
    assert py.shape == (B, num_classes)
    assert all(bool(jnp.all(jnp.isfinite(a)))
               for a in (outputs, mu, logvar, bow, py))

    print("KERNEL_OK")
</pallas_src>

<mosaic_0001>
module attributes {stable_mosaic.version = 11 : i64} {
  func.func @kernel(%arg0: i32, %arg1: memref<8x1xi32, #tpu.memory_space<vmem>>, %arg2: memref<8x8x16xf32, #tpu.memory_space<vmem>>, %arg3: memref<4x16x32xf32, #tpu.memory_space<vmem>>, %arg4: memref<4x32x32xf32, #tpu.memory_space<vmem>>, %arg5: memref<4x1x32xf32, #tpu.memory_space<vmem>>, %arg6: memref<8x32xf32, #tpu.memory_space<vmem>>, %arg7: memref<8x32xf32, #tpu.memory_space<vmem>>, %arg8: memref<8x32xf32, #tpu.memory_space<vmem>>) attributes {dimension_semantics = [#tpu.dimension_semantics<arbitrary>], iteration_bounds = array<i64: 1>, scalar_prefetch = 0 : i64, scratch_operands = 2 : i64, tpu.core_type = #tpu.core_type<tc>, window_params = [{pipeline_mode = #tpu.pipeline_mode<synchronous>, transform_indices = @transform_0, window_bounds = array<i64: 8, 1>}, {transform_indices = @transform_1, window_bounds = array<i64: 8, 8, 16>}, {pipeline_mode = #tpu.pipeline_mode<synchronous>, transform_indices = @transform_2, window_bounds = array<i64: 4, 16, 32>}, {pipeline_mode = #tpu.pipeline_mode<synchronous>, transform_indices = @transform_3, window_bounds = array<i64: 4, 32, 32>}, {pipeline_mode = #tpu.pipeline_mode<synchronous>, transform_indices = @transform_4, window_bounds = array<i64: 4, 1, 32>}, {pipeline_mode = #tpu.pipeline_mode<synchronous>, transform_indices = @transform_5, window_bounds = array<i64: 8, 32>}]} {
    %c0_i32 = arith.constant 0 : i32
    %0 = arith.cmpi eq, %arg0, %c0_i32 : i32
    %1 = arith.extui %0 : i1 to i32
    %c0_i32_0 = arith.constant 0 : i32
    %2 = arith.cmpi ne, %1, %c0_i32_0 : i32
    scf.if %2 {
      %cst_108 = arith.constant 0.000000e+00 : f32
      %403 = vector.broadcast %cst_108 : f32 to vector<8x32xf32>
      %c0_109 = arith.constant 0 : index
      %c0_110 = arith.constant 0 : index
      %404 = vector.load %arg7[%c0_109, %c0_110] : memref<8x32xf32, #tpu.memory_space<vmem>>, vector<8x32xf32>
      tpu.vector_store %arg7[%c0_109, %c0_110], %403 {strides = array<i32>} : memref<8x32xf32, #tpu.memory_space<vmem>>, vector<8x32xf32>,
      %cst_111 = arith.constant 0.000000e+00 : f32
      %405 = vector.broadcast %cst_111 : f32 to vector<8x32xf32>
      %c0_112 = arith.constant 0 : index
      %c0_113 = arith.constant 0 : index
      %406 = vector.load %arg8[%c0_112, %c0_113] : memref<8x32xf32, #tpu.memory_space<vmem>>, vector<8x32xf32>
      tpu.vector_store %arg8[%c0_112, %c0_113], %405 {strides = array<i32>} : memref<8x32xf32, #tpu.memory_space<vmem>>, vector<8x32xf32>,
    } else {
    }
    %c0 = arith.constant 0 : index
    %c0_1 = arith.constant 0 : index
    %3 = vector.load %arg1[%c0, %c0_1] : memref<8x1xi32, #tpu.memory_space<vmem>>, vector<8x1xi32>
    %c8_i32 = arith.constant 8 : i32
    %4 = arith.muli %arg0, %c8_i32 : i32
    %c0_2 = arith.constant 0 : index
    %c0_3 = arith.constant 0 : index
    %c0_4 = arith.constant 0 : index
    %5 = vector.load %arg2[%c0_2, %c0_3, %c0_4] : memref<8x8x16xf32, #tpu.memory_space<vmem>>, vector<8x8x16xf32>
    %6 = vector.shape_cast %5 : vector<8x8x16xf32> to vector<64x16xf32>
    %7 = arith.truncf %6 : vector<64x16xf32> to vector<64x16xbf16>
    %c0_5 = arith.constant 0 : index
    %c0_6 = arith.constant 0 : index
    %c0_7 = arith.constant 0 : index
    %8 = vector.load %arg4[%c0_5, %c0_6, %c0_7] : memref<4x32x32xf32, #tpu.memory_space<vmem>>, vector<1x32x32xf32>
    %9 = vector.shape_cast %8 : vector<1x32x32xf32> to vector<32x32xf32>
    %10 = arith.truncf %9 : vector<32x32xf32> to vector<32x32xbf16>
    %c1 = arith.constant 1 : index
    %c0_8 = arith.constant 0 : index
    %c0_9 = arith.constant 0 : index
    %11 = vector.load %arg4[%c1, %c0_8, %c0_9] : memref<4x32x32xf32, #tpu.memory_space<vmem>>, vector<1x32x32xf32>
    %12 = vector.shape_cast %11 : vector<1x32x32xf32> to vector<32x32xf32>
    %13 = arith.truncf %12 : vector<32x32xf32> to vector<32x32xbf16>
    %c2 = arith.constant 2 : index
    %c0_10 = arith.constant 0 : index
    %c0_11 = arith.constant 0 : index
    %14 = vector.load %arg4[%c2, %c0_10, %c0_11] : memref<4x32x32xf32, #tpu.memory_space<vmem>>, vector<1x32x32xf32>
    %15 = vector.shape_cast %14 : vector<1x32x32xf32> to vector<32x32xf32>
    %16 = arith.truncf %15 : vector<32x32xf32> to vector<32x32xbf16>
    %c3 = arith.constant 3 : index
    %c0_12 = arith.constant 0 : index
    %c0_13 = arith.constant 0 : index
    %17 = vector.load %arg4[%c3, %c0_12, %c0_13] : memref<4x32x32xf32, #tpu.memory_space<vmem>>, vector<1x32x32xf32>
    %18 = vector.shape_cast %17 : vector<1x32x32xf32> to vector<32x32xf32>
    %19 = arith.truncf %18 : vector<32x32xf32> to vector<32x32xbf16>
    %c0_14 = arith.constant 0 : index
    %c0_15 = arith.constant 0 : index
    %c0_16 = arith.constant 0 : index
    %20 = vector.load %arg3[%c0_14, %c0_15, %c0_16] : memref<4x16x32xf32, #tpu.memory_space<vmem>>, vector<1x16x32xf32>
    %21 = vector.shape_cast %20 : vector<1x16x32xf32> to vector<16x32xf32>
    %22 = arith.truncf %21 : vector<16x32xf32> to vector<16x32xbf16>
    %cst = arith.constant dense<0.000000e+00> : vector<64x32xf32>
    %23 = tpu.matmul %7, %22, %cst {dimension_numbers = #tpu.dot_dimension_numbers<[1], [0], [0], [1], [0, 0, 1, 1], [], []>} : vector<64x16xbf16>, vector<16x32xbf16>, vector<64x32xf32> -> vector<64x32xf32>
    %c0_17 = arith.constant 0 : index
    %c0_18 = arith.constant 0 : index
    %c0_19 = arith.constant 0 : index
    %24 = vector.load %arg5[%c0_17, %c0_18, %c0_19] : memref<4x1x32xf32, #tpu.memory_space<vmem>>, vector<1x1x32xf32>
    %25 = vector.shape_cast %24 : vector<1x1x32xf32> to vector<1x32xf32>
    %26 = vector.broadcast %25 : vector<1x32xf32> to vector<64x32xf32>
    %27 = arith.addf %23, %26 : vector<64x32xf32>
    %c1_20 = arith.constant 1 : index
    %c0_21 = arith.constant 0 : index
    %c0_22 = arith.constant 0 : index
    %28 = vector.load %arg3[%c1_20, %c0_21, %c0_22] : memref<4x16x32xf32, #tpu.memory_space<vmem>>, vector<1x16x32xf32>
    %29 = vector.shape_cast %28 : vector<1x16x32xf32> to vector<16x32xf32>
    %30 = arith.truncf %29 : vector<16x32xf32> to vector<16x32xbf16>
    %cst_23 = arith.constant dense<0.000000e+00> : vector<64x32xf32>
    %31 = tpu.matmul %7, %30, %cst_23 {dimension_numbers = #tpu.dot_dimension_numbers<[1], [0], [0], [1], [0, 0, 1, 1], [], []>} : vector<64x16xbf16>, vector<16x32xbf16>, vector<64x32xf32> -> vector<64x32xf32>
    %c1_24 = arith.constant 1 : index
    %c0_25 = arith.constant 0 : index
    %c0_26 = arith.constant 0 : index
    %32 = vector.load %arg5[%c1_24, %c0_25, %c0_26] : memref<4x1x32xf32, #tpu.memory_space<vmem>>, vector<1x1x32xf32>
    %33 = vector.shape_cast %32 : vector<1x1x32xf32> to vector<1x32xf32>
    %34 = vector.broadcast %33 : vector<1x32xf32> to vector<64x32xf32>
    %35 = arith.addf %31, %34 : vector<64x32xf32>
    %c2_27 = arith.constant 2 : index
    %c0_28 = arith.constant 0 : index
    %c0_29 = arith.constant 0 : index
    %36 = vector.load %arg3[%c2_27, %c0_28, %c0_29] : memref<4x16x32xf32, #tpu.memory_space<vmem>>, vector<1x16x32xf32>
    %37 = vector.shape_cast %36 : vector<1x16x32xf32> to vector<16x32xf32>
    %38 = arith.truncf %37 : vector<16x32xf32> to vector<16x32xbf16>
    %cst_30 = arith.constant dense<0.000000e+00> : vector<64x32xf32>
    %39 = tpu.matmul %7, %38, %cst_30 {dimension_numbers = #tpu.dot_dimension_numbers<[1], [0], [0], [1], [0, 0, 1, 1], [], []>} : vector<64x16xbf16>, vector<16x32xbf16>, vector<64x32xf32> -> vector<64x32xf32>
    %c2_31 = arith.constant 2 : index
    %c0_32 = arith.constant 0 : index
    %c0_33 = arith.constant 0 : index
    %40 = vector.load %arg5[%c2_31, %c0_32, %c0_33] : memref<4x1x32xf32, #tpu.memory_space<vmem>>, vector<1x1x32xf32>
    %41 = vector.shape_cast %40 : vector<1x1x32xf32> to vector<1x32xf32>
    %42 = vector.broadcast %41 : vector<1x32xf32> to vector<64x32xf32>
    %43 = arith.addf %39, %42 : vector<64x32xf32>
    %c3_34 = arith.constant 3 : index
    %c0_35 = arith.constant 0 : index
    %c0_36 = arith.constant 0 : index
    %44 = vector.load %arg3[%c3_34, %c0_35, %c0_36] : memref<4x16x32xf32, #tpu.memory_space<vmem>>, vector<1x16x32xf32>
    %45 = vector.shape_cast %44 : vector<1x16x32xf32> to vector<16x32xf32>
    %46 = arith.truncf %45 : vector<16x32xf32> to vector<16x32xbf16>
    %cst_37 = arith.constant dense<0.000000e+00> : vector<64x32xf32>
    %47 = tpu.matmul %7, %46, %cst_37 {dimension_numbers = #tpu.dot_dimension_numbers<[1], [0], [0], [1], [0, 0, 1, 1], [], []>} : vector<64x16xbf16>, vector<16x32xbf16>, vector<64x32xf32> -> vector<64x32xf32>
    %c3_38 = arith.constant 3 : index
    %c0_39 = arith.constant 0 : index
    %c0_40 = arith.constant 0 : index
    %48 = vector.load %arg5[%c3_38, %c0_39, %c0_40] : memref<4x1x32xf32, #tpu.memory_space<vmem>>, vector<1x1x32xf32>
    %49 = vector.shape_cast %48 : vector<1x1x32xf32> to vector<1x32xf32>
    %50 = vector.broadcast %49 : vector<1x32xf32> to vector<64x32xf32>
    %51 = arith.addf %47, %50 : vector<64x32xf32>
    %c0_41 = arith.constant 0 : index
    %c0_42 = arith.constant 0 : index
    %52 = vector.load %arg7[%c0_41, %c0_42] : memref<8x32xf32, #tpu.memory_space<vmem>>, vector<8x32xf32>
    %c0_43 = arith.constant 0 : index
    %c0_44 = arith.constant 0 : index
    %53 = vector.load %arg8[%c0_43, %c0_44] : memref<8x32xf32, #tpu.memory_space<vmem>>, vector<8x32xf32>
    %54 = vector.extract_strided_slice %27 {offsets = [0, 0], sizes = [8, 32], strides = [1, 1]} : vector<64x32xf32> to vector<8x32xf32>
    %55 = vector.extract_strided_slice %35 {offsets = [0, 0], sizes = [8, 32], strides = [1, 1]} : vector<64x32xf32> to vector<8x32xf32>
    %56 = vector.extract_strided_slice %43 {offsets = [0, 0], sizes = [8, 32], strides = [1, 1]} : vector<64x32xf32> to vector<8x32xf32>
    %57 = vector.extract_strided_slice %51 {offsets = [0, 0], sizes = [8, 32], strides = [1, 1]} : vector<64x32xf32> to vector<8x32xf32>
    %58 = arith.truncf %52 : vector<8x32xf32> to vector<8x32xbf16>
    %cst_45 = arith.constant dense<0.000000e+00> : vector<8x32xf32>
    %59 = tpu.matmul %58, %10, %cst_45 {dimension_numbers = #tpu.dot_dimension_numbers<[1], [0], [0], [1], [0, 0, 1, 1], [], []>} : vector<8x32xbf16>, vector<32x32xbf16>, vector<8x32xf32> -> vector<8x32xf32>
    %60 = arith.addf %54, %59 : vector<8x32xf32>
    %cst_46 = arith.constant dense<0.000000e+00> : vector<8x32xf32>
    %61 = tpu.matmul %58, %13, %cst_46 {dimension_numbers = #tpu.dot_dimension_numbers<[1], [0], [0], [1], [0, 0, 1, 1], [], []>} : vector<8x32xbf16>, vector<32x32xbf16>, vector<8x32xf32> -> vector<8x32xf32>
    %62 = arith.addf %55, %61 : vector<8x32xf32>
    %cst_47 = arith.constant dense<0.000000e+00> : vector<8x32xf32>
    %63 = tpu.matmul %58, %16, %cst_47 {dimension_numbers = #tpu.dot_dimension_numbers<[1], [0], [0], [1], [0, 0, 1, 1], [], []>} : vector<8x32xbf16>, vector<32x32xbf16>, vector<8x32xf32> -> vector<8x32xf32>
    %64 = arith.addf %56, %63 : vector<8x32xf32>
    %cst_48 = arith.constant dense<0.000000e+00> : vector<8x32xf32>
    %65 = tpu.matmul %58, %19, %cst_48 {dimension_numbers = #tpu.dot_dimension_numbers<[1], [0], [0], [1], [0, 0, 1, 1], [], []>} : vector<8x32xbf16>, vector<32x32xbf16>, vector<8x32xf32> -> vector<8x32xf32>
    %66 = arith.addf %57, %65 : vector<8x32xf32>
    %67 = arith.negf %60 : vector<8x32xf32>
    %68 = math.exp %67 : vector<8x32xf32>
    %cst_49 = arith.constant 1.000000e+00 : f32
    %69 = vector.broadcast %cst_49 : f32 to vector<8x32xf32>
    %70 = arith.addf %69, %68 : vector<8x32xf32>
    %71 = arith.divf %69, %70 : vector<8x32xf32>
    %72 = arith.negf %62 : vector<8x32xf32>
    %73 = math.exp %72 : vector<8x32xf32>
    %cst_50 = arith.constant 1.000000e+00 : f32
    %74 = vector.broadcast %cst_50 : f32 to vector<8x32xf32>
    %75 = arith.addf %74, %73 : vector<8x32xf32>
    %76 = arith.divf %74, %75 : vector<8x32xf32>
    %77 = math.tanh %64 : vector<8x32xf32>
    %78 = arith.negf %66 : vector<8x32xf32>
    %79 = math.exp %78 : vector<8x32xf32>
    %cst_51 = arith.constant 1.000000e+00 : f32
    %80 = vector.broadcast %cst_51 : f32 to vector<8x32xf32>
    %81 = arith.addf %80, %79 : vector<8x32xf32>
    %82 = arith.divf %80, %81 : vector<8x32xf32>
    %83 = arith.mulf %76, %53 : vector<8x32xf32>
    %84 = arith.mulf %71, %77 : vector<8x32xf32>
    %85 = arith.addf %83, %84 : vector<8x32xf32>
    %86 = math.tanh %85 : vector<8x32xf32>
    %87 = arith.mulf %82, %86 : vector<8x32xf32>
    %c0_i32_52 = arith.constant 0 : i32
    %88 = arith.addi %4, %c0_i32_52 : i32
    %89 = vector.broadcast %88 : i32 to vector<8x1xi32>
    %90 = arith.cmpi sgt, %3, %89 : vector<8x1xi32>
    %91 = vector.shape_cast %90 : vector<8x1xi1> to vector<8x1xi1>
    %92 = vector.broadcast %91 : vector<8x1xi1> to vector<8x32xi1>
    %93 = arith.select %92, %87, %52 : vector<8x32xi1>, vector<8x32xf32>
    %94 = vector.shape_cast %90 : vector<8x1xi1> to vector<8x1xi1>
    %95 = vector.broadcast %94 : vector<8x1xi1> to vector<8x32xi1>
    %96 = arith.select %95, %85, %53 : vector<8x32xi1>, vector<8x32xf32>
    %97 = vector.extract_strided_slice %27 {offsets = [8, 0], sizes = [8, 32], strides = [1, 1]} : vector<64x32xf32> to vector<8x32xf32>
    %98 = vector.extract_strided_slice %35 {offsets = [8, 0], sizes = [8, 32], strides = [1, 1]} : vector<64x32xf32> to vector<8x32xf32>
    %99 = vector.extract_strided_slice %43 {offsets = [8, 0], sizes = [8, 32], strides = [1, 1]} : vector<64x32xf32> to vector<8x32xf32>
    %100 = vector.extract_strided_slice %51 {offsets = [8, 0], sizes = [8, 32], strides = [1, 1]} : vector<64x32xf32> to vector<8x32xf32>
    %101 = arith.truncf %93 : vector<8x32xf32> to vector<8x32xbf16>
    %cst_53 = arith.constant dense<0.000000e+00> : vector<8x32xf32>
    %102 = tpu.matmul %101, %10, %cst_53 {dimension_numbers = #tpu.dot_dimension_numbers<[1], [0], [0], [1], [0, 0, 1, 1], [], []>} : vector<8x32xbf16>, vector<32x32xbf16>, vector<8x32xf32> -> vector<8x32xf32>
    %103 = arith.addf %97, %102 : vector<8x32xf32>
    %cst_54 = arith.constant dense<0.000000e+00> : vector<8x32xf32>
    %104 = tpu.matmul %101, %13, %cst_54 {dimension_numbers = #tpu.dot_dimension_numbers<[1], [0], [0], [1], [0, 0, 1, 1], [], []>} : vector<8x32xbf16>, vector<32x32xbf16>, vector<8x32xf32> -> vector<8x32xf32>
    %105 = arith.addf %98, %104 : vector<8x32xf32>
    %cst_55 = arith.constant dense<0.000000e+00> : vector<8x32xf32>
    %106 = tpu.matmul %101, %16, %cst_55 {dimension_numbers = #tpu.dot_dimension_numbers<[1], [0], [0], [1], [0, 0, 1, 1], [], []>} : vector<8x32xbf16>, vector<32x32xbf16>, vector<8x32xf32> -> vector<8x32xf32>
    %107 = arith.addf %99, %106 : vector<8x32xf32>
    %cst_56 = arith.constant dense<0.000000e+00> : vector<8x32xf32>
    %108 = tpu.matmul %101, %19, %cst_56 {dimension_numbers = #tpu.dot_dimension_numbers<[1], [0], [0], [1], [0, 0, 1, 1], [], []>} : vector<8x32xbf16>, vector<32x32xbf16>, vector<8x32xf32> -> vector<8x32xf32>
    %109 = arith.addf %100, %108 : vector<8x32xf32>
    %110 = arith.negf %103 : vector<8x32xf32>
    %111 = math.exp %110 : vector<8x32xf32>
    %cst_57 = arith.constant 1.000000e+00 : f32
    %112 = vector.broadcast %cst_57 : f32 to vector<8x32xf32>
    %113 = arith.addf %112, %111 : vector<8x32xf32>
    %114 = arith.divf %112, %113 : vector<8x32xf32>
    %115 = arith.negf %105 : vector<8x32xf32>
    %116 = math.exp %115 : vector<8x32xf32>
    %cst_58 = arith.constant 1.000000e+00 : f32
    %117 = vector.broadcast %cst_58 : f32 to vector<8x32xf32>
    %118 = arith.addf %117, %116 : vector<8x32xf32>
    %119 = arith.divf %117, %118 : vector<8x32xf32>
    %120 = math.tanh %107 : vector<8x32xf32>
    %121 = arith.negf %109 : vector<8x32xf32>
    %122 = math.exp %121 : vector<8x32xf32>
    %cst_59 = arith.constant 1.000000e+00 : f32
    %123 = vector.broadcast %cst_59 : f32 to vector<8x32xf32>
    %124 = arith.addf %123, %122 : vector<8x32xf32>
    %125 = arith.divf %123, %124 : vector<8x32xf32>
    %126 = arith.mulf %119, %96 : vector<8x32xf32>
    %127 = arith.mulf %114, %120 : vector<8x32xf32>
    %128 = arith.addf %126, %127 : vector<8x32xf32>
    %129 = math.tanh %128 : vector<8x32xf32>
    %130 = arith.mulf %125, %129 : vector<8x32xf32>
    %c1_i32 = arith.constant 1 : i32
    %131 = arith.addi %4, %c1_i32 : i32
    %132 = vector.broadcast %131 : i32 to vector<8x1xi32>
    %133 = arith.cmpi sgt, %3, %132 : vector<8x1xi32>
    %134 = vector.shape_cast %133 : vector<8x1xi1> to vector<8x1xi1>
    %135 = vector.broadcast %134 : vector<8x1xi1> to vector<8x32xi1>
    %136 = arith.select %135, %130, %93 : vector<8x32xi1>, vector<8x32xf32>
    %137 = vector.shape_cast %133 : vector<8x1xi1> to vector<8x1xi1>
    %138 = vector.broadcast %137 : vector<8x1xi1> to vector<8x32xi1>
    %139 = arith.select %138, %128, %96 : vector<8x32xi1>, vector<8x32xf32>
    %140 = vector.extract_strided_slice %27 {offsets = [16, 0], sizes = [8, 32], strides = [1, 1]} : vector<64x32xf32> to vector<8x32xf32>
    %141 = vector.extract_strided_slice %35 {offsets = [16, 0], sizes = [8, 32], strides = [1, 1]} : vector<64x32xf32> to vector<8x32xf32>
    %142 = vector.extract_strided_slice %43 {offsets = [16, 0], sizes = [8, 32], strides = [1, 1]} : vector<64x32xf32> to vector<8x32xf32>
    %143 = vector.extract_strided_slice %51 {offsets = [16, 0], sizes = [8, 32], strides = [1, 1]} : vector<64x32xf32> to vector<8x32xf32>
    %144 = arith.truncf %136 : vector<8x32xf32> to vector<8x32xbf16>
    %cst_60 = arith.constant dense<0.000000e+00> : vector<8x32xf32>
    %145 = tpu.matmul %144, %10, %cst_60 {dimension_numbers = #tpu.dot_dimension_numbers<[1], [0], [0], [1], [0, 0, 1, 1], [], []>} : vector<8x32xbf16>, vector<32x32xbf16>, vector<8x32xf32> -> vector<8x32xf32>
    %146 = arith.addf %140, %145 : vector<8x32xf32>
    %cst_61 = arith.constant dense<0.000000e+00> : vector<8x32xf32>
    %147 = tpu.matmul %144, %13, %cst_61 {dimension_numbers = #tpu.dot_dimension_numbers<[1], [0], [0], [1], [0, 0, 1, 1], [], []>} : vector<8x32xbf16>, vector<32x32xbf16>, vector<8x32xf32> -> vector<8x32xf32>
    %148 = arith.addf %141, %147 : vector<8x32xf32>
    %cst_62 = arith.constant dense<0.000000e+00> : vector<8x32xf32>
    %149 = tpu.matmul %144, %16, %cst_62 {dimension_numbers = #tpu.dot_dimension_numbers<[1], [0], [0], [1], [0, 0, 1, 1], [], []>} : vector<8x32xbf16>, vector<32x32xbf16>, vector<8x32xf32> -> vector<8x32xf32>
    %150 = arith.addf %142, %149 : vector<8x32xf32>
    %cst_63 = arith.constant dense<0.000000e+00> : vector<8x32xf32>
    %151 = tpu.matmul %144, %19, %cst_63 {dimension_numbers = #tpu.dot_dimension_numbers<[1], [0], [0], [1], [0, 0, 1, 1], [], []>} : vector<8x32xbf16>, vector<32x32xbf16>, vector<8x32xf32> -> vector<8x32xf32>
    %152 = arith.addf %143, %151 : vector<8x32xf32>
    %153 = arith.negf %146 : vector<8x32xf32>
    %154 = math.exp %153 : vector<8x32xf32>
    %cst_64 = arith.constant 1.000000e+00 : f32
    %155 = vector.broadcast %cst_64 : f32 to vector<8x32xf32>
    %156 = arith.addf %155, %154 : vector<8x32xf32>
    %157 = arith.divf %155, %156 : vector<8x32xf32>
    %158 = arith.negf %148 : vector<8x32xf32>
    %159 = math.exp %158 : vector<8x32xf32>
    %cst_65 = arith.constant 1.000000e+00 : f32
    %160 = vector.broadcast %cst_65 : f32 to vector<8x32xf32>
    %161 = arith.addf %160, %159 : vector<8x32xf32>
    %162 = arith.divf %160, %161 : vector<8x32xf32>
    %163 = math.tanh %150 : vector<8x32xf32>
    %164 = arith.negf %152 : vector<8x32xf32>
    %165 = math.exp %164 : vector<8x32xf32>
    %cst_66 = arith.constant 1.000000e+00 : f32
    %166 = vector.broadcast %cst_66 : f32 to vector<8x32xf32>
    %167 = arith.addf %166, %165 : vector<8x32xf32>
    %168 = arith.divf %166, %167 : vector<8x32xf32>
    %169 = arith.mulf %162, %139 : vector<8x32xf32>
    %170 = arith.mulf %157, %163 : vector<8x32xf32>
    %171 = arith.addf %169, %170 : vector<8x32xf32>
    %172 = math.tanh %171 : vector<8x32xf32>
    %173 = arith.mulf %168, %172 : vector<8x32xf32>
    %c2_i32 = arith.constant 2 : i32
    %174 = arith.addi %4, %c2_i32 : i32
    %175 = vector.broadcast %174 : i32 to vector<8x1xi32>
    %176 = arith.cmpi sgt, %3, %175 : vector<8x1xi32>
    %177 = vector.shape_cast %176 : vector<8x1xi1> to vector<8x1xi1>
    %178 = vector.broadcast %177 : vector<8x1xi1> to vector<8x32xi1>
    %179 = arith.select %178, %173, %136 : vector<8x32xi1>, vector<8x32xf32>
    %180 = vector.shape_cast %176 : vector<8x1xi1> to vector<8x1xi1>
    %181 = vector.broadcast %180 : vector<8x1xi1> to vector<8x32xi1>
    %182 = arith.select %181, %171, %139 : vector<8x32xi1>, vector<8x32xf32>
    %183 = vector.extract_strided_slice %27 {offsets = [24, 0], sizes = [8, 32], strides = [1, 1]} : vector<64x32xf32> to vector<8x32xf32>
    %184 = vector.extract_strided_slice %35 {offsets = [24, 0], sizes = [8, 32], strides = [1, 1]} : vector<64x32xf32> to vector<8x32xf32>
    %185 = vector.extract_strided_slice %43 {offsets = [24, 0], sizes = [8, 32], strides = [1, 1]} : vector<64x32xf32> to vector<8x32xf32>
    %186 = vector.extract_strided_slice %51 {offsets = [24, 0], sizes = [8, 32], strides = [1, 1]} : vector<64x32xf32> to vector<8x32xf32>
    %187 = arith.truncf %179 : vector<8x32xf32> to vector<8x32xbf16>
    %cst_67 = arith.constant dense<0.000000e+00> : vector<8x32xf32>
    %188 = tpu.matmul %187, %10, %cst_67 {dimension_numbers = #tpu.dot_dimension_numbers<[1], [0], [0], [1], [0, 0, 1, 1], [], []>} : vector<8x32xbf16>, vector<32x32xbf16>, vector<8x32xf32> -> vector<8x32xf32>
    %189 = arith.addf %183, %188 : vector<8x32xf32>
    %cst_68 = arith.constant dense<0.000000e+00> : vector<8x32xf32>
    %190 = tpu.matmul %187, %13, %cst_68 {dimension_numbers = #tpu.dot_dimension_numbers<[1], [0], [0], [1], [0, 0, 1, 1], [], []>} : vector<8x32xbf16>, vector<32x32xbf16>, vector<8x32xf32> -> vector<8x32xf32>
    %191 = arith.addf %184, %190 : vector<8x32xf32>
    %cst_69 = arith.constant dense<0.000000e+00> : vector<8x32xf32>
    %192 = tpu.matmul %187, %16, %cst_69 {dimension_numbers = #tpu.dot_dimension_numbers<[1], [0], [0], [1], [0, 0, 1, 1], [], []>} : vector<8x32xbf16>, vector<32x32xbf16>, vector<8x32xf32> -> vector<8x32xf32>
    %193 = arith.addf %185, %192 : vector<8x32xf32>
    %cst_70 = arith.constant dense<0.000000e+00> : vector<8x32xf32>
    %194 = tpu.matmul %187, %19, %cst_70 {dimension_numbers = #tpu.dot_dimension_numbers<[1], [0], [0], [1], [0, 0, 1, 1], [], []>} : vector<8x32xbf16>, vector<32x32xbf16>, vector<8x32xf32> -> vector<8x32xf32>
    %195 = arith.addf %186, %194 : vector<8x32xf32>
    %196 = arith.negf %189 : vector<8x32xf32>
    %197 = math.exp %196 : vector<8x32xf32>
    %cst_71 = arith.constant 1.000000e+00 : f32
    %198 = vector.broadcast %cst_71 : f32 to vector<8x32xf32>
    %199 = arith.addf %198, %197 : vector<8x32xf32>
    %200 = arith.divf %198, %199 : vector<8x32xf32>
    %201 = arith.negf %191 : vector<8x32xf32>
    %202 = math.exp %201 : vector<8x32xf32>
    %cst_72 = arith.constant 1.000000e+00 : f32
    %203 = vector.broadcast %cst_72 : f32 to vector<8x32xf32>
    %204 = arith.addf %203, %202 : vector<8x32xf32>
    %205 = arith.divf %203, %204 : vector<8x32xf32>
    %206 = math.tanh %193 : vector<8x32xf32>
    %207 = arith.negf %195 : vector<8x32xf32>
    %208 = math.exp %207 : vector<8x32xf32>
    %cst_73 = arith.constant 1.000000e+00 : f32
    %209 = vector.broadcast %cst_73 : f32 to vector<8x32xf32>
    %210 = arith.addf %209, %208 : vector<8x32xf32>
    %211 = arith.divf %209, %210 : vector<8x32xf32>
    %212 = arith.mulf %205, %182 : vector<8x32xf32>
    %213 = arith.mulf %200, %206 : vector<8x32xf32>
    %214 = arith.addf %212, %213 : vector<8x32xf32>
    %215 = math.tanh %214 : vector<8x32xf32>
    %216 = arith.mulf %211, %215 : vector<8x32xf32>
    %c3_i32 = arith.constant 3 : i32
    %217 = arith.addi %4, %c3_i32 : i32
    %218 = vector.broadcast %217 : i32 to vector<8x1xi32>
    %219 = arith.cmpi sgt, %3, %218 : vector<8x1xi32>
    %220 = vector.shape_cast %219 : vector<8x1xi1> to vector<8x1xi1>
    %221 = vector.broadcast %220 : vector<8x1xi1> to vector<8x32xi1>
    %222 = arith.select %221, %216, %179 : vector<8x32xi1>, vector<8x32xf32>
    %223 = vector.shape_cast %219 : vector<8x1xi1> to vector<8x1xi1>
    %224 = vector.broadcast %223 : vector<8x1xi1> to vector<8x32xi1>
    %225 = arith.select %224, %214, %182 : vector<8x32xi1>, vector<8x32xf32>
    %226 = vector.extract_strided_slice %27 {offsets = [32, 0], sizes = [8, 32], strides = [1, 1]} : vector<64x32xf32> to vector<8x32xf32>
    %227 = vector.extract_strided_slice %35 {offsets = [32, 0], sizes = [8, 32], strides = [1, 1]} : vector<64x32xf32> to vector<8x32xf32>
    %228 = vector.extract_strided_slice %43 {offsets = [32, 0], sizes = [8, 32], strides = [1, 1]} : vector<64x32xf32> to vector<8x32xf32>
    %229 = vector.extract_strided_slice %51 {offsets = [32, 0], sizes = [8, 32], strides = [1, 1]} : vector<64x32xf32> to vector<8x32xf32>
    %230 = arith.truncf %222 : vector<8x32xf32> to vector<8x32xbf16>
    %cst_74 = arith.constant dense<0.000000e+00> : vector<8x32xf32>
    %231 = tpu.matmul %230, %10, %cst_74 {dimension_numbers = #tpu.dot_dimension_numbers<[1], [0], [0], [1], [0, 0, 1, 1], [], []>} : vector<8x32xbf16>, vector<32x32xbf16>, vector<8x32xf32> -> vector<8x32xf32>
    %232 = arith.addf %226, %231 : vector<8x32xf32>
    %cst_75 = arith.constant dense<0.000000e+00> : vector<8x32xf32>
    %233 = tpu.matmul %230, %13, %cst_75 {dimension_numbers = #tpu.dot_dimension_numbers<[1], [0], [0], [1], [0, 0, 1, 1], [], []>} : vector<8x32xbf16>, vector<32x32xbf16>, vector<8x32xf32> -> vector<8x32xf32>
    %234 = arith.addf %227, %233 : vector<8x32xf32>
    %cst_76 = arith.constant dense<0.000000e+00> : vector<8x32xf32>
    %235 = tpu.matmul %230, %16, %cst_76 {dimension_numbers = #tpu.dot_dimension_numbers<[1], [0], [0], [1], [0, 0, 1, 1], [], []>} : vector<8x32xbf16>, vector<32x32xbf16>, vector<8x32xf32> -> vector<8x32xf32>
    %236 = arith.addf %228, %235 : vector<8x32xf32>
    %cst_77 = arith.constant dense<0.000000e+00> : vector<8x32xf32>
    %237 = tpu.matmul %230, %19, %cst_77 {dimension_numbers = #tpu.dot_dimension_numbers<[1], [0], [0], [1], [0, 0, 1, 1], [], []>} : vector<8x32xbf16>, vector<32x32xbf16>, vector<8x32xf32> -> vector<8x32xf32>
    %238 = arith.addf %229, %237 : vector<8x32xf32>
    %239 = arith.negf %232 : vector<8x32xf32>
    %240 = math.exp %239 : vector<8x32xf32>
    %cst_78 = arith.constant 1.000000e+00 : f32
    %241 = vector.broadcast %cst_78 : f32 to vector<8x32xf32>
    %242 = arith.addf %241, %240 : vector<8x32xf32>
    %243 = arith.divf %241, %242 : vector<8x32xf32>
    %244 = arith.negf %234 : vector<8x32xf32>
    %245 = math.exp %244 : vector<8x32xf32>
    %cst_79 = arith.constant 1.000000e+00 : f32
    %246 = vector.broadcast %cst_79 : f32 to vector<8x32xf32>
    %247 = arith.addf %246, %245 : vector<8x32xf32>
    %248 = arith.divf %246, %247 : vector<8x32xf32>
    %249 = math.tanh %236 : vector<8x32xf32>
    %250 = arith.negf %238 : vector<8x32xf32>
    %251 = math.exp %250 : vector<8x32xf32>
    %cst_80 = arith.constant 1.000000e+00 : f32
    %252 = vector.broadcast %cst_80 : f32 to vector<8x32xf32>
    %253 = arith.addf %252, %251 : vector<8x32xf32>
    %254 = arith.divf %252, %253 : vector<8x32xf32>
    %255 = arith.mulf %248, %225 : vector<8x32xf32>
    %256 = arith.mulf %243, %249 : vector<8x32xf32>
    %257 = arith.addf %255, %256 : vector<8x32xf32>
    %258 = math.tanh %257 : vector<8x32xf32>
    %259 = arith.mulf %254, %258 : vector<8x32xf32>
    %c4_i32 = arith.constant 4 : i32
    %260 = arith.addi %4, %c4_i32 : i32
    %261 = vector.broadcast %260 : i32 to vector<8x1xi32>
    %262 = arith.cmpi sgt, %3, %261 : vector<8x1xi32>
    %263 = vector.shape_cast %262 : vector<8x1xi1> to vector<8x1xi1>
    %264 = vector.broadcast %263 : vector<8x1xi1> to vector<8x32xi1>
    %265 = arith.select %264, %259, %222 : vector<8x32xi1>, vector<8x32xf32>
    %266 = vector.shape_cast %262 : vector<8x1xi1> to vector<8x1xi1>
    %267 = vector.broadcast %266 : vector<8x1xi1> to vector<8x32xi1>
    %268 = arith.select %267, %257, %225 : vector<8x32xi1>, vector<8x32xf32>
    %269 = vector.extract_strided_slice %27 {offsets = [40, 0], sizes = [8, 32], strides = [1, 1]} : vector<64x32xf32> to vector<8x32xf32>
    %270 = vector.extract_strided_slice %35 {offsets = [40, 0], sizes = [8, 32], strides = [1, 1]} : vector<64x32xf32> to vector<8x32xf32>
    %271 = vector.extract_strided_slice %43 {offsets = [40, 0], sizes = [8, 32], strides = [1, 1]} : vector<64x32xf32> to vector<8x32xf32>
    %272 = vector.extract_strided_slice %51 {offsets = [40, 0], sizes = [8, 32], strides = [1, 1]} : vector<64x32xf32> to vector<8x32xf32>
    %273 = arith.truncf %265 : vector<8x32xf32> to vector<8x32xbf16>
    %cst_81 = arith.constant dense<0.000000e+00> : vector<8x32xf32>
    %274 = tpu.matmul %273, %10, %cst_81 {dimension_numbers = #tpu.dot_dimension_numbers<[1], [0], [0], [1], [0, 0, 1, 1], [], []>} : vector<8x32xbf16>, vector<32x32xbf16>, vector<8x32xf32> -> vector<8x32xf32>
    %275 = arith.addf %269, %274 : vector<8x32xf32>
    %cst_82 = arith.constant dense<0.000000e+00> : vector<8x32xf32>
    %276 = tpu.matmul %273, %13, %cst_82 {dimension_numbers = #tpu.dot_dimension_numbers<[1], [0], [0], [1], [0, 0, 1, 1], [], []>} : vector<8x32xbf16>, vector<32x32xbf16>, vector<8x32xf32> -> vector<8x32xf32>
    %277 = arith.addf %270, %276 : vector<8x32xf32>
    %cst_83 = arith.constant dense<0.000000e+00> : vector<8x32xf32>
    %278 = tpu.matmul %273, %16, %cst_83 {dimension_numbers = #tpu.dot_dimension_numbers<[1], [0], [0], [1], [0, 0, 1, 1], [], []>} : vector<8x32xbf16>, vector<32x32xbf16>, vector<8x32xf32> -> vector<8x32xf32>
    %279 = arith.addf %271, %278 : vector<8x32xf32>
    %cst_84 = arith.constant dense<0.000000e+00> : vector<8x32xf32>
    %280 = tpu.matmul %273, %19, %cst_84 {dimension_numbers = #tpu.dot_dimension_numbers<[1], [0], [0], [1], [0, 0, 1, 1], [], []>} : vector<8x32xbf16>, vector<32x32xbf16>, vector<8x32xf32> -> vector<8x32xf32>
    %281 = arith.addf %272, %280 : vector<8x32xf32>
    %282 = arith.negf %275 : vector<8x32xf32>
    %283 = math.exp %282 : vector<8x32xf32>
    %cst_85 = arith.constant 1.000000e+00 : f32
    %284 = vector.broadcast %cst_85 : f32 to vector<8x32xf32>
    %285 = arith.addf %284, %283 : vector<8x32xf32>
    %286 = arith.divf %284, %285 : vector<8x32xf32>
    %287 = arith.negf %277 : vector<8x32xf32>
    %288 = math.exp %287 : vector<8x32xf32>
    %cst_86 = arith.constant 1.000000e+00 : f32
    %289 = vector.broadcast %cst_86 : f32 to vector<8x32xf32>
    %290 = arith.addf %289, %288 : vector<8x32xf32>
    %291 = arith.divf %289, %290 : vector<8x32xf32>
    %292 = math.tanh %279 : vector<8x32xf32>
    %293 = arith.negf %281 : vector<8x32xf32>
    %294 = math.exp %293 : vector<8x32xf32>
    %cst_87 = arith.constant 1.000000e+00 : f32
    %295 = vector.broadcast %cst_87 : f32 to vector<8x32xf32>
    %296 = arith.addf %295, %294 : vector<8x32xf32>
    %297 = arith.divf %295, %296 : vector<8x32xf32>
    %298 = arith.mulf %291, %268 : vector<8x32xf32>
    %299 = arith.mulf %286, %292 : vector<8x32xf32>
    %300 = arith.addf %298, %299 : vector<8x32xf32>
    %301 = math.tanh %300 : vector<8x32xf32>
    %302 = arith.mulf %297, %301 : vector<8x32xf32>
    %c5_i32 = arith.constant 5 : i32
    %303 = arith.addi %4, %c5_i32 : i32
    %304 = vector.broadcast %303 : i32 to vector<8x1xi32>
    %305 = arith.cmpi sgt, %3, %304 : vector<8x1xi32>
    %306 = vector.shape_cast %305 : vector<8x1xi1> to vector<8x1xi1>
    %307 = vector.broadcast %306 : vector<8x1xi1> to vector<8x32xi1>
    %308 = arith.select %307, %302, %265 : vector<8x32xi1>, vector<8x32xf32>
    %309 = vector.shape_cast %305 : vector<8x1xi1> to vector<8x1xi1>
    %310 = vector.broadcast %309 : vector<8x1xi1> to vector<8x32xi1>
    %311 = arith.select %310, %300, %268 : vector<8x32xi1>, vector<8x32xf32>
    %312 = vector.extract_strided_slice %27 {offsets = [48, 0], sizes = [8, 32], strides = [1, 1]} : vector<64x32xf32> to vector<8x32xf32>
    %313 = vector.extract_strided_slice %35 {offsets = [48, 0], sizes = [8, 32], strides = [1, 1]} : vector<64x32xf32> to vector<8x32xf32>
    %314 = vector.extract_strided_slice %43 {offsets = [48, 0], sizes = [8, 32], strides = [1, 1]} : vector<64x32xf32> to vector<8x32xf32>
    %315 = vector.extract_strided_slice %51 {offsets = [48, 0], sizes = [8, 32], strides = [1, 1]} : vector<64x32xf32> to vector<8x32xf32>
    %316 = arith.truncf %308 : vector<8x32xf32> to vector<8x32xbf16>
    %cst_88 = arith.constant dense<0.000000e+00> : vector<8x32xf32>
    %317 = tpu.matmul %316, %10, %cst_88 {dimension_numbers = #tpu.dot_dimension_numbers<[1], [0], [0], [1], [0, 0, 1, 1], [], []>} : vector<8x32xbf16>, vector<32x32xbf16>, vector<8x32xf32> -> vector<8x32xf32>
    %318 = arith.addf %312, %317 : vector<8x32xf32>
    %cst_89 = arith.constant dense<0.000000e+00> : vector<8x32xf32>
    %319 = tpu.matmul %316, %13, %cst_89 {dimension_numbers = #tpu.dot_dimension_numbers<[1], [0], [0], [1], [0, 0, 1, 1], [], []>} : vector<8x32xbf16>, vector<32x32xbf16>, vector<8x32xf32> -> vector<8x32xf32>
    %320 = arith.addf %313, %319 : vector<8x32xf32>
    %cst_90 = arith.constant dense<0.000000e+00> : vector<8x32xf32>
    %321 = tpu.matmul %316, %16, %cst_90 {dimension_numbers = #tpu.dot_dimension_numbers<[1], [0], [0], [1], [0, 0, 1, 1], [], []>} : vector<8x32xbf16>, vector<32x32xbf16>, vector<8x32xf32> -> vector<8x32xf32>
    %322 = arith.addf %314, %321 : vector<8x32xf32>
    %cst_91 = arith.constant dense<0.000000e+00> : vector<8x32xf32>
    %323 = tpu.matmul %316, %19, %cst_91 {dimension_numbers = #tpu.dot_dimension_numbers<[1], [0], [0], [1], [0, 0, 1, 1], [], []>} : vector<8x32xbf16>, vector<32x32xbf16>, vector<8x32xf32> -> vector<8x32xf32>
    %324 = arith.addf %315, %323 : vector<8x32xf32>
    %325 = arith.negf %318 : vector<8x32xf32>
    %326 = math.exp %325 : vector<8x32xf32>
    %cst_92 = arith.constant 1.000000e+00 : f32
    %327 = vector.broadcast %cst_92 : f32 to vector<8x32xf32>
    %328 = arith.addf %327, %326 : vector<8x32xf32>
    %329 = arith.divf %327, %328 : vector<8x32xf32>
    %330 = arith.negf %320 : vector<8x32xf32>
    %331 = math.exp %330 : vector<8x32xf32>
    %cst_93 = arith.constant 1.000000e+00 : f32
    %332 = vector.broadcast %cst_93 : f32 to vector<8x32xf32>
    %333 = arith.addf %332, %331 : vector<8x32xf32>
    %334 = arith.divf %332, %333 : vector<8x32xf32>
    %335 = math.tanh %322 : vector<8x32xf32>
    %336 = arith.negf %324 : vector<8x32xf32>
    %337 = math.exp %336 : vector<8x32xf32>
    %cst_94 = arith.constant 1.000000e+00 : f32
    %338 = vector.broadcast %cst_94 : f32 to vector<8x32xf32>
    %339 = arith.addf %338, %337 : vector<8x32xf32>
    %340 = arith.divf %338, %339 : vector<8x32xf32>
    %341 = arith.mulf %334, %311 : vector<8x32xf32>
    %342 = arith.mulf %329, %335 : vector<8x32xf32>
    %343 = arith.addf %341, %342 : vector<8x32xf32>
    %344 = math.tanh %343 : vector<8x32xf32>
    %345 = arith.mulf %340, %344 : vector<8x32xf32>
    %c6_i32 = arith.constant 6 : i32
    %346 = arith.addi %4, %c6_i32 : i32
    %347 = vector.broadcast %346 : i32 to vector<8x1xi32>
    %348 = arith.cmpi sgt, %3, %347 : vector<8x1xi32>
    %349 = vector.shape_cast %348 : vector<8x1xi1> to vector<8x1xi1>
    %350 = vector.broadcast %349 : vector<8x1xi1> to vector<8x32xi1>
    %351 = arith.select %350, %345, %308 : vector<8x32xi1>, vector<8x32xf32>
    %352 = vector.shape_cast %348 : vector<8x1xi1> to vector<8x1xi1>
    %353 = vector.broadcast %352 : vector<8x1xi1> to vector<8x32xi1>
    %354 = arith.select %353, %343, %311 : vector<8x32xi1>, vector<8x32xf32>
    %355 = vector.extract_strided_slice %27 {offsets = [56, 0], sizes = [8, 32], strides = [1, 1]} : vector<64x32xf32> to vector<8x32xf32>
    %356 = vector.extract_strided_slice %35 {offsets = [56, 0], sizes = [8, 32], strides = [1, 1]} : vector<64x32xf32> to vector<8x32xf32>
    %357 = vector.extract_strided_slice %43 {offsets = [56, 0], sizes = [8, 32], strides = [1, 1]} : vector<64x32xf32> to vector<8x32xf32>
    %358 = vector.extract_strided_slice %51 {offsets = [56, 0], sizes = [8, 32], strides = [1, 1]} : vector<64x32xf32> to vector<8x32xf32>
    %359 = arith.truncf %351 : vector<8x32xf32> to vector<8x32xbf16>
    %cst_95 = arith.constant dense<0.000000e+00> : vector<8x32xf32>
    %360 = tpu.matmul %359, %10, %cst_95 {dimension_numbers = #tpu.dot_dimension_numbers<[1], [0], [0], [1], [0, 0, 1, 1], [], []>} : vector<8x32xbf16>, vector<32x32xbf16>, vector<8x32xf32> -> vector<8x32xf32>
    %361 = arith.addf %355, %360 : vector<8x32xf32>
    %cst_96 = arith.constant dense<0.000000e+00> : vector<8x32xf32>
    %362 = tpu.matmul %359, %13, %cst_96 {dimension_numbers = #tpu.dot_dimension_numbers<[1], [0], [0], [1], [0, 0, 1, 1], [], []>} : vector<8x32xbf16>, vector<32x32xbf16>, vector<8x32xf32> -> vector<8x32xf32>
    %363 = arith.addf %356, %362 : vector<8x32xf32>
    %cst_97 = arith.constant dense<0.000000e+00> : vector<8x32xf32>
    %364 = tpu.matmul %359, %16, %cst_97 {dimension_numbers = #tpu.dot_dimension_numbers<[1], [0], [0], [1], [0, 0, 1, 1], [], []>} : vector<8x32xbf16>, vector<32x32xbf16>, vector<8x32xf32> -> vector<8x32xf32>
    %365 = arith.addf %357, %364 : vector<8x32xf32>
    %cst_98 = arith.constant dense<0.000000e+00> : vector<8x32xf32>
    %366 = tpu.matmul %359, %19, %cst_98 {dimension_numbers = #tpu.dot_dimension_numbers<[1], [0], [0], [1], [0, 0, 1, 1], [], []>} : vector<8x32xbf16>, vector<32x32xbf16>, vector<8x32xf32> -> vector<8x32xf32>
    %367 = arith.addf %358, %366 : vector<8x32xf32>
    %368 = arith.negf %361 : vector<8x32xf32>
    %369 = math.exp %368 : vector<8x32xf32>
    %cst_99 = arith.constant 1.000000e+00 : f32
    %370 = vector.broadcast %cst_99 : f32 to vector<8x32xf32>
    %371 = arith.addf %370, %369 : vector<8x32xf32>
    %372 = arith.divf %370, %371 : vector<8x32xf32>
    %373 = arith.negf %363 : vector<8x32xf32>
    %374 = math.exp %373 : vector<8x32xf32>
    %cst_100 = arith.constant 1.000000e+00 : f32
    %375 = vector.broadcast %cst_100 : f32 to vector<8x32xf32>
    %376 = arith.addf %375, %374 : vector<8x32xf32>
    %377 = arith.divf %375, %376 : vector<8x32xf32>
    %378 = math.tanh %365 : vector<8x32xf32>
    %379 = arith.negf %367 : vector<8x32xf32>
    %380 = math.exp %379 : vector<8x32xf32>
    %cst_101 = arith.constant 1.000000e+00 : f32
    %381 = vector.broadcast %cst_101 : f32 to vector<8x32xf32>
    %382 = arith.addf %381, %380 : vector<8x32xf32>
    %383 = arith.divf %381, %382 : vector<8x32xf32>
    %384 = arith.mulf %377, %354 : vector<8x32xf32>
    %385 = arith.mulf %372, %378 : vector<8x32xf32>
    %386 = arith.addf %384, %385 : vector<8x32xf32>
    %387 = math.tanh %386 : vector<8x32xf32>
    %388 = arith.mulf %383, %387 : vector<8x32xf32>
    %c7_i32 = arith.constant 7 : i32
    %389 = arith.addi %4, %c7_i32 : i32
    %390 = vector.broadcast %389 : i32 to vector<8x1xi32>
    %391 = arith.cmpi sgt, %3, %390 : vector<8x1xi32>
    %392 = vector.shape_cast %391 : vector<8x1xi1> to vector<8x1xi1>
    %393 = vector.broadcast %392 : vector<8x1xi1> to vector<8x32xi1>
    %394 = arith.select %393, %388, %351 : vector<8x32xi1>, vector<8x32xf32>
    %395 = vector.shape_cast %391 : vector<8x1xi1> to vector<8x1xi1>
    %396 = vector.broadcast %395 : vector<8x1xi1> to vector<8x32xi1>
    %397 = arith.select %396, %386, %354 : vector<8x32xi1>, vector<8x32xf32>
    %c0_102 = arith.constant 0 : index
    %c0_103 = arith.constant 0 : index
    %398 = vector.load %arg7[%c0_102, %c0_103] : memref<8x32xf32, #tpu.memory_space<vmem>>, vector<8x32xf32>
    tpu.vector_store %arg7[%c0_102, %c0_103], %394 {strides = array<i32>} : memref<8x32xf32, #tpu.memory_space<vmem>>, vector<8x32xf32>,
    %c0_104 = arith.constant 0 : index
    %c0_105 = arith.constant 0 : index
    %399 = vector.load %arg8[%c0_104, %c0_105] : memref<8x32xf32, #tpu.memory_space<vmem>>, vector<8x32xf32>
    tpu.vector_store %arg8[%c0_104, %c0_105], %397 {strides = array<i32>} : memref<8x32xf32, #tpu.memory_space<vmem>>, vector<8x32xf32>,
    %c0_i32_106 = arith.constant 0 : i32
    %400 = arith.cmpi eq, %arg0, %c0_i32_106 : i32
    %401 = arith.extui %400 : i1 to i32
    %c0_i32_107 = arith.constant 0 : i32
    %402 = arith.cmpi ne, %401, %c0_i32_107 : i32
    scf.if %402 {
      %c0_108 = arith.constant 0 : index
      %c0_109 = arith.constant 0 : index
      %403 = vector.load %arg6[%c0_108, %c0_109] : memref<8x32xf32, #tpu.memory_space<vmem>>, vector<8x32xf32>
      tpu.vector_store %arg6[%c0_108, %c0_109], %394 {strides = array<i32>} : memref<8x32xf32, #tpu.memory_space<vmem>>, vector<8x32xf32>,
    } else {
    }
    return
  }
  func.func @transform_0(%arg0: i32) -> (i32, i32) {
    %c0_i32 = arith.constant 0 : i32
    %c0_i32_0 = arith.constant 0 : i32
    %c0_i32_1 = arith.constant 0 : i32
    return %c0_i32, %c0_i32_0 : i32, i32
  }
  func.func @transform_1(%arg0: i32) -> (i32, i32, i32) {
    %c0_i32 = arith.constant 0 : i32
    %c0_i32_0 = arith.constant 0 : i32
    %c0_i32_1 = arith.constant 0 : i32
    return %arg0, %c0_i32, %c0_i32_0 : i32, i32, i32
  }
  func.func @transform_2(%arg0: i32) -> (i32, i32, i32) {
    %c0_i32 = arith.constant 0 : i32
    %c0_i32_0 = arith.constant 0 : i32
    %c0_i32_1 = arith.constant 0 : i32
    %c0_i32_2 = arith.constant 0 : i32
    return %c0_i32, %c0_i32_0, %c0_i32_1 : i32, i32, i32
  }
  func.func @transform_3(%arg0: i32) -> (i32, i32, i32) {
    %c0_i32 = arith.constant 0 : i32
    %c0_i32_0 = arith.constant 0 : i32
    %c0_i32_1 = arith.constant 0 : i32
    %c0_i32_2 = arith.constant 0 : i32
    return %c0_i32, %c0_i32_0, %c0_i32_1 : i32, i32, i32
  }
  func.func @transform_4(%arg0: i32) -> (i32, i32, i32) {
    %c0_i32 = arith.constant 0 : i32
    %c0_i32_0 = arith.constant 0 : i32
    %c0_i32_1 = arith.constant 0 : i32
    %c0_i32_2 = arith.constant 0 : i32
    return %c0_i32, %c0_i32_0, %c0_i32_1 : i32, i32, i32
  }
  func.func @transform_5(%arg0: i32) -> (i32, i32) {
    %c0_i32 = arith.constant 0 : i32
    %c0_i32_0 = arith.constant 0 : i32
    %c0_i32_1 = arith.constant 0 : i32
    return %c0_i32, %c0_i32_0 : i32, i32
  }
}

</mosaic_0001>

<bundles_post_ra>
// kernel: tpu_custom_call.1
= control target key start
LH: loop header
LB: loop body
LE: loop exit
PB: predicated region body
PF: predicated region fallthrough
CT: control target
= control target key end

     0   :  { %10 = vsyncpa [#allocation5], 0  ;;  %s3367_s0 = inlined_call_operand.vmem [shape: s32[8,1], index: 0, kind: input, shape index: {}]   ;;  %s3368_s1 = inlined_call_operand.hbm [shape: f32[8,8,16], index: 1, kind: input, shape index: {}]   ;;  %s3369_s2 = inlined_call_operand.hbm [shape: f32[4,16,32], index: 2, kind: input, shape index: {}]   ;;  %s3370_s3 = inlined_call_operand.hbm [shape: f32[4,32,32], index: 3, kind: input, shape index: {}]   ;;  %s3371_s4 = inlined_call_operand.vmem [shape: f32[4,1,32], index: 4, kind: input, shape index: {}]   ;;  %s3372_s5 = inlined_call_operand.hbm [shape: f32[8,32], index: 5, kind: output, shape index: {}]  }
   0x1   :  { %11 = vsyncpa [#allocation8], 0 }
   0x2   :  { %12 = vsyncpa [#allocation6], 0  ;;  %s2794_s18 = smov [#allocation7]   ;;  %s2795_s20 = smov [#allocation4]  }
   0x3   :  { %s32_s19 = sshll.u32 %s2794_s18, 4  ;;  %s20_s21 = sshll.u32 %s2795_s20, 4  ;;  %s33_s19 = int_to_ptr.vmem [resolvable:$true] %s32_s19  ;;  %s2833_s21 = int_to_ptr.vmem [resolvable:$true] %s20_s21 }
   0x4   :  { %s2700_s24 = scalar_lea.hbm %s3369_s2, 1024 }
   0x5   :  { %p2701_p0 = scmp.ne.s32.totalorder %s3369_s2, %s2700_s24  ;;  %p2704_p1 = scmp.lt.u32.totalorder %s2700_s24, %s3369_s2 }
   0x7   :  { %p2706_p2 = pnand %p2704_p1, %p2701_p0 }
   0x9   :  { %2709 = shalt.err (!%p2706_p2)
}
   0xa   :  { %s2710_s29 = scalar_lea.vmem %s33_s19, 1024  ;;  %p2715_p4 = scmp.lt.s32.totalorder %s33_s19, %s33_s19 }
   0xb   :  { %p2711_p3 = scmp.ne.s32.totalorder %s33_s19, %s2710_s29  ;;  %p2716_p5 = scmp.lt.s32.totalorder %s2710_s29, %s2710_s29 }
   0xd   :  { %p2717_p6 = por %p2716_p5, %p2715_p4 }
   0xf   :  { %p2718_p7 = pnand %p2717_p6, %p2711_p3 }
  0x11   :  { %2721 = shalt.err (!%p2718_p7)
}
  0x12   :  { %s2796_s30 = smov 128   ;;  %s2797_s6 = smov 8  }
  0x13   :  { %38 = dma.hbm_to_vmem [thread:$0]  %s3369_s2, 1024, %s33_s19, [#allocation8], %s2796_s30, %s2796_s30, %s2797_s6  }
  0x14   :  { %s2722_s11 = scalar_lea.hbm %s3368_s1, 1024 }
  0x15   :  { %p2723_p8 = scmp.ne.s32.totalorder %s3368_s1, %s2722_s11  ;;  %p2726_p9 = scmp.lt.u32.totalorder %s2722_s11, %s3368_s1 }
  0x17   :  { %p2728_p10 = pnand %p2726_p9, %p2723_p8 }
  0x19   :  { %2731 = shalt.err (!%p2728_p10)
}
  0x1a   :  { %s2732_s16 = scalar_lea.vmem %s2833_s21, 1024  ;;  %p2737_p12 = scmp.lt.s32.totalorder %s2833_s21, %s2833_s21 }
  0x1b   :  { %p2733_p11 = scmp.ne.s32.totalorder %s2833_s21, %s2732_s16  ;;  %p2738_p13 = scmp.lt.s32.totalorder %s2732_s16, %s2732_s16 }
  0x1d   :  { %p2739_p0 = por %p2738_p13, %p2737_p12 }
  0x1f   :  { %p2740_p1 = pnand %p2739_p0, %p2733_p11 }
  0x21   :  { %2743 = shalt.err (!%p2740_p1)
}
  0x22   :  { %26 = dma.hbm_to_vmem [thread:$0]  %s3368_s1, 1024, %s2833_s21, [#allocation5], %s2796_s30, %s2796_s30, %s2797_s6  }
  0x23   :  { %s2798_s18 = smov [#allocation9]   ;;  %s2744_s23 = scalar_lea.hbm %s3370_s3, 2048 }
  0x24   :  { %s44_s19 = sshll.u32 %s2798_s18, 4  ;;  %p2745_p2 = scmp.ne.s32.totalorder %s3370_s3, %s2744_s23  ;;  %s45_s19 = int_to_ptr.vmem [resolvable:$true] %s44_s19 }
  0x25   :  { %p2748_p3 = scmp.lt.u32.totalorder %s2744_s23, %s3370_s3 }
  0x27   :  { %p2750_p4 = pnand %p2748_p3, %p2745_p2 }
  0x29   :  { %2753 = shalt.err (!%p2750_p4)
}
  0x2a   :  { %s2754_s28 = scalar_lea.vmem %s45_s19, 2048  ;;  %p2759_p6 = scmp.lt.s32.totalorder %s45_s19, %s45_s19 }
  0x2b   :  { %p2755_p5 = scmp.ne.s32.totalorder %s45_s19, %s2754_s28  ;;  %p2760_p7 = scmp.lt.s32.totalorder %s2754_s28, %s2754_s28 }
  0x2d   :  { %p2761_p8 = por %p2760_p7, %p2759_p6 }
  0x2f   :  { %p2762_p9 = pnand %p2761_p8, %p2755_p5 }
  0x31   :  { %2765 = shalt.err (!%p2762_p9)
}
  0x32   :  { %50 = dma.hbm_to_vmem [thread:$0]  %s3370_s3, 2048, %s45_s19, [#allocation8], %s2796_s30, %s2796_s30, %s2797_s6  }
  0x33   :  { %2788 = dma.done.wait [#allocation5], 1024  }
  0x34   :  { %2789 = vsyncadd [#allocation5], 4294966272 }
  0x35   :  { %2790 = dma.done.wait [#allocation8], 3072  }
  0x36   :  { %2791 = vsyncadd [#allocation8], 4294964224  ;;  %vm67_vm0 = vcmask 261120   ;;  %v2799_v0 = vmov 0.0   ;;  %v3373_v1 = vmov 0   ;;  %v111_v2 = vld [vmem:[#allocation7] sm:$0xff] }
  0x37   :  { %68 = vst.msk [vmem:[#allocation2] sm:$0xff] %vm67_vm0, %v2799_v0  ;;  %69 = vst.msk [vmem:[#allocation3] sm:$0xff] %vm67_vm0, %v2799_v0  ;;  %2570 = vset.pattern.permute.xlu0 %v3373_v1  ;;  %2571 = vset.pattern.permute.xlu1 %v3373_v1  ;;  %v112_v3 = vld [vmem:[#allocation7 + $0x8] sm:$0xff]  ;;  %v200_v4 = vld [vmem:[#allocation7 + $0x10] sm:$0xff]  ;;  %vm121_vm1 = vcmask 130048   ;;  %vm2801_vm6 = vmmov 0  }
  0x38   :  { %v113_v5 = vpack.c.bf16 %v112_v3, %v111_v2  ;;  %v201_v6 = vld [vmem:[#allocation7 + $0x18] sm:$0xff]  ;;  %v72_v7 = vld [vmem:[#allocation4] sm:$0xff]  ;;  %v73_v8 = vld [vmem:[#allocation4 + $0x8] sm:$0xff] }
  0x39   :  { %v202_v9 = vpack.c.bf16 %v201_v6, %v200_v4  ;;  %v80_v10 = vpack.c.bf16 %v73_v8, %v72_v7  ;;  %v74_v11 = vld [vmem:[#allocation4 + $0x10] sm:$0xff]  ;;  %v75_v12 = vld [vmem:[#allocation4 + $0x18] sm:$0xff]  ;;  %v277_v13 = vld [vmem:[#allocation7 + $0x20] sm:$0xff] }
  0x3a   :  { %2265 = vmatprep.subr.bf16.mxu0 %v113_v5  ;;  %v81_v14 = vpack.c.bf16 %v75_v12, %v74_v11  ;;  %v278_v15 = vld [vmem:[#allocation7 + $0x28] sm:$0xff]  ;;  %v354_v16 = vld [vmem:[#allocation7 + $0x30] sm:$0xff]  ;;  %v355_v17 = vld [vmem:[#allocation7 + $0x38] sm:$0xff] }
  0x3b   :  { %2275 = vmatprep.subr.bf16.mxu1 %v202_v9  ;;  %2266 = vmatpush3.bf16.msra.mxu0 %v113_v5  ;;  %v279_v18 = vpack.c.bf16 %v278_v15, %v277_v13  ;;  %v356_v19 = vpack.c.bf16 %v355_v17, %v354_v16  ;;  %v76_v20 = vld [vmem:[#allocation4 + $0x20] sm:$0xff]  ;;  %v77_v21 = vld [vmem:[#allocation4 + $0x28] sm:$0xff]  ;;  %v78_v23 = vld [vmem:[#allocation4 + $0x30] sm:$0xff] }
  0x3c   :  { %2276 = vmatpush3.bf16.msra.mxu1 %v202_v9  ;;  %2267 = vmatprep.mubr.msk.bf16.mxu0 %vm121_vm1, %v80_v10  ;;  %v82_v22 = vpack.c.bf16 %v77_v21, %v76_v20  ;;  %v79_v24 = vld [vmem:[#allocation4 + $0x38] sm:$0xff]  ;;  %v2902_v26 = vld [vmem:[%s3367_s0] sm:$0xff]  ;;  %v84_v29 = vld [vmem:[#allocation9] sm:$0xff] }
  0x3d   :  { %2277 = vmatprep.mubr.msk.bf16.mxu1 %vm121_vm1, %v80_v10  ;;  %2285 = vmatprep.subr.bf16.mxu0 %v279_v18  ;;  %v83_v25 = vpack.c.bf16 %v79_v24, %v78_v23  ;;  %vm626_vm2 = vcmp.gt.s32.totalorder %v2902_v26, 0  ;;  %vm828_vm3 = vcmp.gt.s32.totalorder %v2902_v26, 1  ;;  %vm1434_vm4 = vcmp.gt.s32.totalorder %v2902_v26, 4  ;;  %v85_v30 = vld [vmem:[#allocation9 + $0x8] sm:$0xff]  ;;  %v91_v31 = vld [vmem:[#allocation9 + $0x20] sm:$0xff]  ;;  %v86_v36 = vld [vmem:[#allocation9 + $0x10] sm:$0xff] }
  0x3e   :  { %2268 = vmatmul.mubr.msk.bf16.vlgmr.msra.gmra.mrb[0].mxu0 %vm121_vm1, %v81_v14  ;;  %2295 = vmatprep.subr.bf16.mxu1 %v356_v19  ;;  %v627_v27 = vsel %vm626_vm2, 1, %v3373_v1  ;;  %v829_v28 = vsel %vm828_vm3, 1, %v3373_v1  ;;  %v92_v32 = vld [vmem:[#allocation9 + $0x28] sm:$0xff]  ;;  %v1435_v33 = vsel %vm1434_vm4, 1, %v3373_v1  ;;  %v2914_v34 = vpack.c.bf16 %v85_v30, %v84_v29  ;;  %v87_v37 = vld [vmem:[#allocation9 + $0x18] sm:$0xff]  ;;  %v93_v38 = vld [vmem:[#allocation9 + $0x30] sm:$0xff] }
  0x3f   :  { %2278 = vmatmul.mubr.msk.bf16.vlgmr.msra.gmra.mrb[0].mxu1 %vm121_vm1, %v81_v14  ;;  %2286 = vmatpush3.bf16.msra.mxu0 %v279_v18  ;;  %v2916_v35 = vpack.c.bf16 %v92_v32, %v91_v31  ;;  %vm1838_vm5 = vcmp.gt.s32.totalorder %v2902_v26, 6  ;;  %v94_v39 = vld [vmem:[#allocation9 + $0x38] sm:$0xff]  ;;  %v2922_v40 = vpack.c.bf16 %v87_v37, %v86_v36  ;;  %v2940_v43 = vld [vmem:[#allocation2] sm:$0xff]  ;;  %v98_v44 = vld [vmem:[#allocation9 + $0x40] sm:$0xff]  ;;  %vm1030_vm8 = vcmp.gt.s32.totalorder %v2902_v26, 2 }
  0x40   :  { %2296 = vmatpush3.bf16.msra.mxu1 %v356_v19  ;;  %2271 = vmatprep.mubr.msk.bf16.mxu0 %vm121_vm1, %v82_v22  ;;  %v1839_v41 = vsel %vm1838_vm5, 1, %v3373_v1  ;;  %v2927_v42 = vpack.c.bf16 %v94_v39, %v93_v38  ;;  %v99_v45 = vld [vmem:[#allocation9 + $0x48] sm:$0xff]  ;;  %v105_v46 = vld [vmem:[#allocation9 + $0x60] sm:$0xff]  ;;  %v432_v48 = vpack.c.bf16 %v2940_v43, %v2940_v43  ;;  %v100_v51 = vld [vmem:[#allocation9 + $0x50] sm:$0xff]  ;;  %vm1232_vm9 = vcmp.gt.s32.totalorder %v2902_v26, 3 }
  0x41   :  { %2281 = vmatprep.mubr.msk.bf16.mxu1 %vm121_vm1, %v82_v22  ;;  %2305 = vmatprep.subr.bf16.mxu0 %v2799_v0  ;;  %v106_v47 = vld [vmem:[#allocation9 + $0x68] sm:$0xff]  ;;  %v2946_v49 = vpack.c.bf16 %v99_v45, %v98_v44  ;;  %v101_v52 = vld [vmem:[#allocation9 + $0x58] sm:$0xff]  ;;  %v107_v53 = vld [vmem:[#allocation9 + $0x70] sm:$0xff]  ;;  %vm1636_vm10 = vcmp.gt.s32.totalorder %v2902_v26, 5  ;;  %vm2040_vm11 = vcmp.gt.s32.totalorder %v2902_v26, 7 }
  0x42   :  { %2313 = vmatprep.subr.bf16.mxu1 %v2799_v0  ;;  %629 = vperm.xlu0 %2570, %v627_v27   ;;  %v2948_v50 = vpack.c.bf16 %v106_v47, %v105_v46  ;;  %v108_v54 = vld [vmem:[#allocation9 + $0x78] sm:$0xff]  ;;  %v2953_v55 = vpack.c.bf16 %v101_v52, %v100_v51  ;;  %v2985_v57 = vld [vmem:[%s3371_s4] ss:$0 sm:$0xff]  ;;  %v2990_v58 = vld [vmem:[%s3371_s4 + $0x1] ss:$0 sm:$0xff] }
  0x43   :  { %v2957_v56 = vpack.c.bf16 %v108_v54, %v107_v53  ;;  %v2088_v29 = vld [vmem:[%s3371_s4 + $0x3] ss:$0 sm:$0xff] }
  0x46   :  { %2272 = vmatmul.mubr.msk.bf16.gmra.mrb[4].mxu0 %vm121_vm1, %v83_v25  ;;  %831 = vperm.xlu0 %2570, %v829_v28   ;;  %v2082_v28 = vld [vmem:[%s3371_s4 + $0x2] ss:$0 sm:$0xff]  ;;  %s2802_s4 = smov [#allocation10]  }
  0x47   :  { %2282 = vmatmul.mubr.msk.bf16.gmra.mrb[4].mxu1 %vm121_vm1, %v83_v25  ;;  %2287 = vmatprep.mubr.msk.bf16.mxu0 %vm121_vm1, %v80_v10  ;;  %s2060_s12 = sshll.u32 %s2802_s4, 4  ;;  %s2061_s12 = int_to_ptr.vmem [resolvable:$true] %s2060_s12 }
  0x48   :  { %2297 = vmatprep.mubr.msk.bf16.mxu1 %vm121_vm1, %v80_v10  ;;  %s2766_s13 = scalar_lea.vmem %s2061_s12, 128  ;;  %p2771_p11 = scmp.lt.s32.totalorder %s2061_s12, %s2061_s12 }
  0x49   :  { %p2767_p10 = scmp.ne.s32.totalorder %s2061_s12, %s2766_s13  ;;  %p2772_p12 = scmp.lt.s32.totalorder %s2766_s13, %s2766_s13 }
  0x4a   :  { %1437 = vperm.xlu0 %2570, %v1435_v33  }
  0x4b   :  { %p2773_p13 = por %p2772_p12, %p2771_p11 }
  0x4d   :  { %p2774_p0 = pnand %p2773_p13, %p2767_p10 }
  0x4e   :  { %2288 = vmatmul.mubr.msk.bf16.vlgmr.msra.gmra.mrb[8].mxu0 %vm121_vm1, %v81_v14  ;;  %1841 = vperm.xlu0 %2570, %v1839_v41  }
  0x4f   :  { %2298 = vmatmul.mubr.msk.bf16.vlgmr.msra.gmra.mrb[8].mxu1 %vm121_vm1, %v81_v14  ;;  %2306 = vmatpush3.bf16.msra.mxu0 %v2914_v34 }
  0x50   :  { %2314 = vmatpush3.bf16.msra.mxu1 %v2916_v35  ;;  %2291 = vmatprep.mubr.msk.bf16.mxu0 %vm121_vm1, %v82_v22 }
  0x51   :  { %2301 = vmatprep.mubr.msk.bf16.mxu1 %vm121_vm1, %v82_v22  ;;  %2307 = vmatprep.subr.bf16.mxu0 %v2799_v0 }
  0x52   :  { %2315 = vmatprep.subr.bf16.mxu1 %v2799_v0 }
  0x53   :  { %2308 = vmatpush3.bf16.msra.mxu0 %v2922_v40 }
  0x54   :  { %2316 = vmatpush3.bf16.msra.mxu1 %v2927_v42  ;;  %2321 = vmatprep.subr.bf16.mxu0 %v2799_v0 }
  0x55   :  { %2329 = vmatprep.subr.bf16.mxu1 %v2799_v0 }
  0x56   :  { %2292 = vmatmul.mubr.msk.bf16.gmra.mrb[12].mxu0 %vm121_vm1, %v83_v25 }
  0x57   :  { %2302 = vmatmul.mubr.msk.bf16.gmra.mrb[12].mxu1 %vm121_vm1, %v83_v25  ;;  %2309 = vmatprep.mubr.msk.bf16.mxu0 %vm2801_vm6, %v2799_v0 }
  0x58   :  { %2317 = vmatprep.mubr.msk.bf16.mxu1 %vm2801_vm6, %v2799_v0 }
  0x5e   :  { %2310 = vmatmul.mubr.msk.bf16.vlgmr.msra.gmra.mrb[16].mxu0 %vm67_vm0, %v432_v48 }
  0x5f   :  { %2318 = vmatmul.mubr.msk.bf16.vlgmr.msra.gmra.mrb[16].mxu1 %vm67_vm0, %v432_v48  ;;  %2322 = vmatpush3.bf16.msra.mxu0 %v2946_v49 }
  0x60   :  { %2330 = vmatpush3.bf16.msra.mxu1 %v2948_v50  ;;  %2323 = vmatprep.subr.bf16.mxu0 %v2799_v0 }
  0x61   :  { %2331 = vmatprep.subr.bf16.mxu1 %v2799_v0  ;;  %2325 = vmatprep.mubr.msk.bf16.mxu0 %vm2801_vm6, %v2799_v0 }
  0x62   :  { %2333 = vmatprep.mubr.msk.bf16.mxu1 %vm2801_vm6, %v2799_v0 }
  0x63   :  { %2324 = vmatpush3.bf16.msra.mxu0 %v2953_v55 }
  0x64   :  { %2332 = vmatpush3.bf16.msra.mxu1 %v2957_v56  ;;  %2337 = vmatprep.subr.bf16.mxu0 %v2799_v0 }
  0x65   :  { %2345 = vmatprep.subr.bf16.mxu1 %v2799_v0 }
  0x66   :  { %2326 = vmatmul.mubr.msk.bf16.vlgmr.msra.gmra.mrb[20].mxu0 %vm67_vm0, %v432_v48 }
  0x67   :  { %2334 = vmatmul.mubr.msk.bf16.vlgmr.msra.gmra.mrb[20].mxu1 %vm67_vm0, %v432_v48  ;;  %2338 = vmatpush3.bf16.msra.mxu0 %v2914_v34 }
  0x68   :  { %2346 = vmatpush3.bf16.msra.mxu1 %v2916_v35  ;;  %2339 = vmatprep.subr.bf16.mxu0 %v2799_v0 }
  0x69   :  { %2347 = vmatprep.subr.bf16.mxu1 %v2799_v0  ;;  %2341 = vmatprep.mubr.msk.bf16.mxu0 %vm2801_vm6, %v2799_v0 }
  0x6a   :  { %2349 = vmatprep.mubr.msk.bf16.mxu1 %vm2801_vm6, %v2799_v0 }
  0x6b   :  { %2340 = vmatpush3.bf16.msra.mxu0 %v2922_v40 }
  0x6c   :  { %2348 = vmatpush3.bf16.msra.mxu1 %v2927_v42  ;;  %2353 = vmatprep.subr.bf16.mxu0 %v2799_v0 }
  0x6d   :  { %2361 = vmatprep.subr.bf16.mxu1 %v2799_v0 }
 0x111   :  { %v2269_v59 = vpop.f32.mrb[0].mxu0 }
 0x112   :  { %v2993_v60 = vadd.f32 %v2269_v59, %v2985_v57  ;;  %v2279_v61 = vpop.f32.mrb[0].mxu1  ;;  %v168_v62 = vpop.f32.mrb[1].mxu0 }
 0x113   :  { %v2996_v63 = vadd.f32 %v2279_v61, %v2990_v58  ;;  %v245_v2 = vpop.f32.mrb[1].mxu1  ;;  %v2270_v3 = vpop.f32.mrb[2].mxu0 }
 0x114   :  { %v2999_v4 = vadd.f32 %v2270_v3, %v2985_v57  ;;  %v2280_v5 = vpop.f32.mrb[2].mxu1  ;;  %v171_v6 = vpop.f32.mrb[3].mxu0 }
 0x115   :  { %v3002_v7 = vadd.f32 %v2280_v5, %v2990_v58  ;;  %v3005_v8 = vadd.f32 %v2985_v57, %v171_v6  ;;  %v248_v9 = vpop.f32.mrb[3].mxu1 }
 0x116   :  { %v3008_v10 = vadd.f32 %v2990_v58, %v248_v9 }
 0x119   :  { %v2273_v11 = vpop.f32.mrb[4].mxu0 }
 0x11a   :  { %v3011_v12 = vadd.f32 %v2273_v11, %v2985_v57  ;;  %v2283_v13 = vpop.f32.mrb[4].mxu1  ;;  %v184_v14 = vpop.f32.mrb[5].mxu0 }
 0x11b   :  { %v3014_v15 = vadd.f32 %v2283_v13, %v2990_v58  ;;  %v3017_v16 = vadd.f32 %v2985_v57, %v184_v14  ;;  %v261_v17 = vpop.f32.mrb[5].mxu1  ;;  %v2274_v18 = vpop.f32.mrb[6].mxu0 }
 0x11c   :  { %v3020_v19 = vadd.f32 %v2990_v58, %v261_v17  ;;  %v3023_v20 = vadd.f32 %v2274_v18, %v2985_v57  ;;  %v2284_v21 = vpop.f32.mrb[6].mxu1  ;;  %v187_v22 = vpop.f32.mrb[7].mxu0 }
 0x11d   :  { %v3026_v23 = vadd.f32 %v2284_v21, %v2990_v58  ;;  %v3029_v24 = vadd.f32 %v2985_v57, %v187_v22  ;;  %v264_v25 = vpop.f32.mrb[7].mxu1  ;;  %v169_v22 = vadd.f32 %v2985_v57, %v168_v62 }
 0x11e   :  { %v3032_v27 = vadd.f32 %v2990_v58, %v264_v25  ;;  %v246_v25 = vadd.f32 %v2990_v58, %v245_v2 }
 0x121   :  { %v2289_v30 = vpop.f32.mrb[8].mxu0 }
 0x122   :  { %v3040_v31 = vadd.f32 %v2289_v30, %v2082_v28  ;;  %v2299_v32 = vpop.f32.mrb[8].mxu1  ;;  %v322_v33 = vpop.f32.mrb[9].mxu0 }
 0x123   :  { %v3042_v36 = vadd.f32 %v2299_v32, %v2088_v29  ;;  %v399_v37 = vpop.f32.mrb[9].mxu1  ;;  %v2290_v38 = vpop.f32.mrb[10].mxu0 }
 0x124   :  { %v3044_v39 = vadd.f32 %v2290_v38, %v2082_v28  ;;  %v2300_v41 = vpop.f32.mrb[10].mxu1  ;;  %v325_v44 = vpop.f32.mrb[11].mxu0 }
 0x125   :  { %v3046_v45 = vadd.f32 %v2300_v41, %v2088_v29  ;;  %v3048_v46 = vadd.f32 %v2082_v28, %v325_v44  ;;  %v402_v47 = vpop.f32.mrb[11].mxu1 }
 0x126   :  { %v3050_v48 = vadd.f32 %v2088_v29, %v402_v47 }
 0x129   :  { %v2293_v51 = vpop.f32.mrb[12].mxu0 }
 0x12a   :  { %v3052_v52 = vadd.f32 %v2293_v51, %v2082_v28  ;;  %v2303_v53 = vpop.f32.mrb[12].mxu1  ;;  %v338_v54 = vpop.f32.mrb[13].mxu0 }
 0x12b   :  { %v3054_v59 = vadd.f32 %v2303_v53, %v2088_v29  ;;  %v3056_v61 = vadd.f32 %v2082_v28, %v338_v54  ;;  %v415_v3 = vpop.f32.mrb[13].mxu1  ;;  %v2294_v5 = vpop.f32.mrb[14].mxu0 }
 0x12c   :  { %v3058_v6 = vadd.f32 %v2088_v29, %v415_v3  ;;  %v3060_v9 = vadd.f32 %v2294_v5, %v2082_v28  ;;  %v2304_v11 = vpop.f32.mrb[14].mxu1  ;;  %v341_v13 = vpop.f32.mrb[15].mxu0 }
 0x12d   :  { %v3062_v14 = vadd.f32 %v2304_v11, %v2088_v29  ;;  %v3064_v17 = vadd.f32 %v2082_v28, %v341_v13  ;;  %v418_v18 = vpop.f32.mrb[15].mxu1  ;;  %v323_v13 = vadd.f32 %v2082_v28, %v322_v33 }
 0x12e   :  { %v3066_v21 = vadd.f32 %v2088_v29, %v418_v18  ;;  %v400_v18 = vadd.f32 %v2088_v29, %v399_v37  ;;  %v630_v37 = vpop.permute.xlu0 %629 }
 0x12f   :  { %vm631_vm7 = vcmp.eq.s32.totalorder %v630_v37, 1 }
 0x131   :  { %v471_v30 = vpop.f32.mrb[16].mxu0 }
 0x132   :  { %v477_v32 = vadd.f32 %v471_v30, %v169_v22  ;;  %v512_v38 = vpop.f32.mrb[16].mxu1  ;;  %v2311_v41 = vpop.f32.mrb[17].mxu0 }
 0x133   :  { %v518_v44 = vadd.f32 %v512_v38, %v246_v25  ;;  %v2319_v47 = vpop.f32.mrb[17].mxu1  ;;  %v474_v51 = vpop.f32.mrb[18].mxu0 }
 0x134   :  { %v2097_v53 = vmul.f32 -1.442695, %v477_v32  ;;  %v515_v54 = vpop.f32.mrb[18].mxu1  ;;  %v2312_v3 = vpop.f32.mrb[19].mxu0 }
 0x135   :  { %v2098_v5 = vmul.f32 -1.442695, %v518_v44  ;;  %v2320_v11 = vpop.f32.mrb[19].mxu1 }
 0x136   :  { %2572 = vpow2.f32 %v2097_v53 }
 0x137   :  { %2574 = vpow2.f32 %v2098_v5 }
 0x139   :  { %v553_v1 = vpop.f32.mrb[20].mxu0 }
 0x13a   :  { %v559_v57 = vadd.f32 %v553_v1, %v323_v13  ;;  %v594_v62 = vpop.f32.mrb[20].mxu1  ;;  %v2327_v58 = vpop.f32.mrb[21].mxu0  ;;  %v431_v1 = vld [vmem:[#allocation3] sm:$0xff] }
 0x13b   :  { %v600_v2 = vadd.f32 %v594_v62, %v400_v18  ;;  %v2335_v22 = vpop.f32.mrb[21].mxu1  ;;  %v556_v30 = vpop.f32.mrb[22].mxu0 }
 0x13c   :  { %v597_v41 = vpop.f32.mrb[22].mxu1  ;;  %v2328_v25 = vpop.f32.mrb[23].mxu0 }
 0x13d   :  { %v2099_v38 = vmul.f32 -1.442695, %v600_v2  ;;  %v2336_v47 = vpop.f32.mrb[23].mxu1 }
 0x13f   :  { %2576 = vpow2.f32 %v2099_v38 }
 0x140   :  { %v2573_v32 = vpop.eup %2572  ;;  %2578 = vtanh.f32 %v559_v57 }
 0x141   :  { %v2575_v51 = vpop.eup %2574  ;;  %v604_v54 = vadd.f32 1.0, %v2573_v32 }
 0x142   :  { %v610_v44 = vadd.f32 1.0, %v2575_v51 }
 0x143   :  { %2580 = vrcp.f32 %v604_v54 }
 0x144   :  { %2582 = vrcp.f32 %v610_v44 }
 0x149   :  { %v2577_v28 = vpop.eup %2576 }
 0x14a   :  { %v2579_v29 = vpop.eup %2578  ;;  %v617_v3 = vadd.f32 1.0, %v2577_v28 }
 0x14c   :  { %2584 = vrcp.f32 %v617_v3 }
 0x14d   :  { %v2581_v33 = vpop.eup %2580 }
 0x14e   :  { %v2583_v53 = vpop.eup %2582  ;;  %v621_v5 = vmul.f32 %v2581_v33, %v2579_v29 }
 0x14f   :  { %v620_v11 = vmul.f32 %v2583_v53, %v431_v1 }
 0x151   :  { %v622_v13 = vadd.f32 %v621_v5, %v620_v11 }
 0x153   :  { %2586 = vtanh.f32 %v622_v13  ;;  %v3070_v18 = vsel %vm631_vm7, %v622_v13, %v431_v1 }
 0x156   :  { %v2585_v62 = vpop.eup %2584 }
 0x15d   :  { %v2587_v58 = vpop.eup %2586 }
 0x15e   :  { %v624_v57 = vmul.f32 %v2587_v58, %v2585_v62 }
 0x160   :  { %v3073_v2 = vsel %vm631_vm7, %v624_v57, %v2940_v43  ;;  %v3375_v43 = vmov 0  }
 0x161   :  { %v634_v22 = vpack.c.bf16 %v3073_v2, %v3073_v2  ;;  %v1031_v30 = vsel %vm1030_vm8, 1, %v3375_v43  ;;  %v1233_v41 = vsel %vm1232_vm9, 1, %v3375_v43  ;;  %v1637_v25 = vsel %vm1636_vm10, 1, %v3375_v43 }
 0x162   :  { %1033 = vperm.xlu1 %2571, %v1031_v30   ;;  %v2041_v38 = vsel %vm2040_vm11, 1, %v3375_v43 }
 0x163   :  { %2342 = vmatmul.mubr.msk.bf16.vlgmr.msra.gmra.mrb[24].mxu0 %vm67_vm0, %v634_v22  ;;  %2350 = vmatmul.mubr.msk.bf16.vlgmr.msra.gmra.mrb[24].mxu1 %vm67_vm0, %v634_v22 }
 0x164   :  { %2354 = vmatpush3.bf16.msra.mxu0 %v2946_v49  ;;  %2362 = vmatpush3.bf16.msra.mxu1 %v2948_v50 }
 0x165   :  { %2355 = vmatprep.subr.bf16.mxu0 %v2799_v0  ;;  %2363 = vmatprep.subr.bf16.mxu1 %v2799_v0 }
 0x166   :  { %2357 = vmatprep.mubr.msk.bf16.mxu0 %vm2801_vm6, %v2799_v0  ;;  %2365 = vmatprep.mubr.msk.bf16.mxu1 %vm2801_vm6, %v2799_v0 }
 0x167   :  { %1235 = vperm.xlu1 %2571, %v1233_v41  }
 0x168   :  { %2356 = vmatpush3.bf16.msra.mxu0 %v2953_v55  ;;  %2364 = vmatpush3.bf16.msra.mxu1 %v2957_v56 }
 0x169   :  { %2369 = vmatprep.subr.bf16.mxu0 %v2799_v0  ;;  %2377 = vmatprep.subr.bf16.mxu1 %v2799_v0 }
 0x16b   :  { %2358 = vmatmul.mubr.msk.bf16.vlgmr.msra.gmra.mrb[28].mxu0 %vm67_vm0, %v634_v22  ;;  %2366 = vmatmul.mubr.msk.bf16.vlgmr.msra.gmra.mrb[28].mxu1 %vm67_vm0, %v634_v22 }
 0x16c   :  { %2370 = vmatpush3.bf16.msra.mxu0 %v2914_v34  ;;  %2378 = vmatpush3.bf16.msra.mxu1 %v2916_v35 }
 0x16d   :  { %2371 = vmatprep.subr.bf16.mxu0 %v2799_v0  ;;  %2379 = vmatprep.subr.bf16.mxu1 %v2799_v0 }
 0x16e   :  { %2373 = vmatprep.mubr.msk.bf16.mxu0 %vm2801_vm6, %v2799_v0  ;;  %2381 = vmatprep.mubr.msk.bf16.mxu1 %vm2801_vm6, %v2799_v0 }
 0x16f   :  { %1639 = vperm.xlu1 %2571, %v1637_v25  }
 0x170   :  { %2372 = vmatpush3.bf16.msra.mxu0 %v2922_v40  ;;  %2380 = vmatpush3.bf16.msra.mxu1 %v2927_v42 }
 0x171   :  { %2385 = vmatprep.subr.bf16.mxu0 %v2799_v0  ;;  %2393 = vmatprep.subr.bf16.mxu1 %v2799_v0 }
 0x173   :  { %2043 = vperm.xlu1 %2571, %v2041_v38  }
 0x236   :  { %v672_v47 = vpop.f32.mrb[24].mxu0  ;;  %v713_v32 = vpop.f32.mrb[24].mxu1 }
 0x237   :  { %v678_v51 = vadd.f32 %v672_v47, %v3005_v8  ;;  %v719_v54 = vadd.f32 %v713_v32, %v3008_v10  ;;  %v2343_v44 = vpop.f32.mrb[25].mxu0  ;;  %v2351_v28 = vpop.f32.mrb[25].mxu1 }
 0x238   :  { %v675_v29 = vpop.f32.mrb[26].mxu0  ;;  %v716_v1 = vpop.f32.mrb[26].mxu1 }
 0x239   :  { %v2104_v33 = vmul.f32 -1.442695, %v678_v51  ;;  %v2105_v37 = vmul.f32 -1.442695, %v719_v54  ;;  %v2344_v53 = vpop.f32.mrb[27].mxu0  ;;  %v2352_v3 = vpop.f32.mrb[27].mxu1 }
 0x23a   :  { %v832_v28 = vpop.permute.xlu0 %831 }
 0x23b   :  { %2588 = vpow2.f32 %v2104_v33  ;;  %vm833_vm12 = vcmp.eq.s32.totalorder %v832_v28, 1 }
 0x23c   :  { %2590 = vpow2.f32 %v2105_v37 }
 0x23e   :  { %v754_v26 = vpop.f32.mrb[28].mxu0  ;;  %v795_v5 = vpop.f32.mrb[28].mxu1 }
 0x23f   :  { %v760_v11 = vadd.f32 %v754_v26, %v3048_v46  ;;  %v801_v13 = vadd.f32 %v795_v5, %v3050_v48  ;;  %v2359_v62 = vpop.f32.mrb[29].mxu0  ;;  %v2367_v8 = vpop.f32.mrb[29].mxu1 }
 0x240   :  { %v757_v58 = vpop.f32.mrb[30].mxu0  ;;  %v798_v10 = vpop.f32.mrb[30].mxu1 }
 0x241   :  { %v2360_v57 = vpop.f32.mrb[31].mxu0  ;;  %v2368_v22 = vpop.f32.mrb[31].mxu1  ;;  %v2106_v43 = vmul.f32 -1.442695, %v801_v13 }
 0x243   :  { %2592 = vpow2.f32 %v2106_v43 }
 0x244   :  { %2594 = vtanh.f32 %v760_v11 }
 0x245   :  { %v2589_v30 = vpop.eup %2588 }
 0x246   :  { %v2591_v41 = vpop.eup %2590  ;;  %v805_v25 = vadd.f32 1.0, %v2589_v30 }
 0x247   :  { %v811_v38 = vadd.f32 1.0, %v2591_v41 }
 0x248   :  { %2596 = vrcp.f32 %v805_v25 }
 0x249   :  { %2598 = vrcp.f32 %v811_v38 }
 0x24d   :  { %v2593_v47 = vpop.eup %2592 }
 0x24e   :  { %v2595_v32 = vpop.eup %2594  ;;  %v818_v54 = vadd.f32 1.0, %v2593_v47 }
 0x250   :  { %2600 = vrcp.f32 %v818_v54 }
 0x252   :  { %v2597_v46 = vpop.eup %2596 }
 0x253   :  { %v2599_v51 = vpop.eup %2598  ;;  %v822_v48 = vmul.f32 %v2597_v46, %v2595_v32 }
 0x254   :  { %v821_v44 = vmul.f32 %v2599_v51, %v3070_v18 }
 0x256   :  { %v823_v29 = vadd.f32 %v822_v48, %v821_v44 }
 0x258   :  { %2602 = vtanh.f32 %v823_v29  ;;  %v3119_v1 = vsel %vm833_vm12, %v823_v29, %v3070_v18 }
 0x25a   :  { %v2601_v33 = vpop.eup %2600 }
 0x262   :  { %v2603_v37 = vpop.eup %2602 }
 0x263   :  { %v825_v53 = vmul.f32 %v2603_v37, %v2601_v33 }
 0x265   :  { %v3122_v3 = vsel %vm833_vm12, %v825_v53, %v3073_v2  ;;  %v1034_v53 = vpop.permute.xlu1 %1033 }
 0x266   :  { %v836_v26 = vpack.c.bf16 %v3122_v3, %v3122_v3  ;;  %vm1035_vm13 = vcmp.eq.s32.totalorder %v1034_v53, 1 }
 0x268   :  { %2374 = vmatmul.mubr.msk.bf16.vlgmr.msra.gmra.mrb[32].mxu0 %vm67_vm0, %v836_v26  ;;  %2382 = vmatmul.mubr.msk.bf16.vlgmr.msra.gmra.mrb[32].mxu1 %vm67_vm0, %v836_v26 }
 0x269   :  { %2386 = vmatpush3.bf16.msra.mxu0 %v2946_v49  ;;  %2394 = vmatpush3.bf16.msra.mxu1 %v2948_v50 }
 0x26a   :  { %2387 = vmatprep.subr.bf16.mxu0 %v2799_v0  ;;  %2395 = vmatprep.subr.bf16.mxu1 %v2799_v0 }
 0x26b   :  { %2389 = vmatprep.mubr.msk.bf16.mxu0 %vm2801_vm6, %v2799_v0  ;;  %2397 = vmatprep.mubr.msk.bf16.mxu1 %vm2801_vm6, %v2799_v0 }
 0x26d   :  { %2388 = vmatpush3.bf16.msra.mxu0 %v2953_v55  ;;  %2396 = vmatpush3.bf16.msra.mxu1 %v2957_v56 }
 0x26e   :  { %2401 = vmatprep.subr.bf16.mxu0 %v2799_v0  ;;  %2409 = vmatprep.subr.bf16.mxu1 %v2799_v0 }
 0x270   :  { %2390 = vmatmul.mubr.msk.bf16.vlgmr.msra.gmra.mrb[36].mxu0 %vm67_vm0, %v836_v26  ;;  %2398 = vmatmul.mubr.msk.bf16.vlgmr.msra.gmra.mrb[36].mxu1 %vm67_vm0, %v836_v26 }
 0x271   :  { %2402 = vmatpush3.bf16.msra.mxu0 %v2914_v34  ;;  %2410 = vmatpush3.bf16.msra.mxu1 %v2916_v35 }
 0x272   :  { %2403 = vmatprep.subr.bf16.mxu0 %v2799_v0  ;;  %2411 = vmatprep.subr.bf16.mxu1 %v2799_v0 }
 0x273   :  { %2405 = vmatprep.mubr.msk.bf16.mxu0 %vm2801_vm6, %v2799_v0  ;;  %2413 = vmatprep.mubr.msk.bf16.mxu1 %vm2801_vm6, %v2799_v0 }
 0x275   :  { %2404 = vmatpush3.bf16.msra.mxu0 %v2922_v40  ;;  %2412 = vmatpush3.bf16.msra.mxu1 %v2927_v42 }
 0x276   :  { %2417 = vmatprep.subr.bf16.mxu0 %v2799_v0  ;;  %2425 = vmatprep.subr.bf16.mxu1 %v2799_v0 }
 0x33b   :  { %v874_v18 = vpop.f32.mrb[32].mxu0  ;;  %v915_v2 = vpop.f32.mrb[32].mxu1 }
 0x33c   :  { %v880_v5 = vadd.f32 %v874_v18, %v2993_v60  ;;  %v921_v11 = vadd.f32 %v915_v2, %v2996_v63  ;;  %v2375_v13 = vpop.f32.mrb[33].mxu0  ;;  %v2383_v62 = vpop.f32.mrb[33].mxu1 }
 0x33d   :  { %v877_v8 = vpop.f32.mrb[34].mxu0  ;;  %v918_v58 = vpop.f32.mrb[34].mxu1 }
 0x33e   :  { %v2111_v10 = vmul.f32 -1.442695, %v880_v5  ;;  %v2112_v57 = vmul.f32 -1.442695, %v921_v11  ;;  %v2376_v22 = vpop.f32.mrb[35].mxu0  ;;  %v2384_v43 = vpop.f32.mrb[35].mxu1 }
 0x340   :  { %2604 = vpow2.f32 %v2111_v10 }
 0x341   :  { %2606 = vpow2.f32 %v2112_v57 }
 0x343   :  { %v956_v30 = vpop.f32.mrb[36].mxu0  ;;  %v997_v41 = vpop.f32.mrb[36].mxu1 }
 0x344   :  { %v962_v25 = vadd.f32 %v956_v30, %v3040_v31  ;;  %v1003_v38 = vadd.f32 %v997_v41, %v3042_v36  ;;  %v2391_v47 = vpop.f32.mrb[37].mxu0  ;;  %v2399_v60 = vpop.f32.mrb[37].mxu1 }
 0x345   :  { %v959_v32 = vpop.f32.mrb[38].mxu0  ;;  %v1000_v63 = vpop.f32.mrb[38].mxu1 }
 0x346   :  { %v2392_v46 = vpop.f32.mrb[39].mxu0  ;;  %v2400_v51 = vpop.f32.mrb[39].mxu1  ;;  %v2113_v48 = vmul.f32 -1.442695, %v1003_v38 }
 0x348   :  { %2608 = vpow2.f32 %v2113_v48 }
 0x349   :  { %2610 = vtanh.f32 %v962_v25 }
 0x34a   :  { %v2605_v54 = vpop.eup %2604 }
 0x34b   :  { %v2607_v44 = vpop.eup %2606  ;;  %v1007_v28 = vadd.f32 1.0, %v2605_v54 }
 0x34c   :  { %v1013_v29 = vadd.f32 1.0, %v2607_v44 }
 0x34d   :  { %2612 = vrcp.f32 %v1007_v28 }
 0x34e   :  { %2614 = vrcp.f32 %v1013_v29 }
 0x352   :  { %v2609_v33 = vpop.eup %2608 }
 0x353   :  { %v2611_v37 = vpop.eup %2610  ;;  %v1020_v26 = vadd.f32 1.0, %v2609_v33 }
 0x355   :  { %2616 = vrcp.f32 %v1020_v26 }
 0x357   :  { %v2613_v31 = vpop.eup %2612 }
 0x358   :  { %v2615_v36 = vpop.eup %2614  ;;  %v1024_v18 = vmul.f32 %v2613_v31, %v2611_v37 }
 0x359   :  { %v1023_v2 = vmul.f32 %v2615_v36, %v3119_v1 }
 0x35b   :  { %v1025_v5 = vadd.f32 %v1024_v18, %v1023_v2 }
 0x35d   :  { %2618 = vtanh.f32 %v1025_v5  ;;  %v3160_v11 = vsel %vm1035_vm13, %v1025_v5, %v3119_v1 }
 0x35f   :  { %v2617_v13 = vpop.eup %2616 }
 0x367   :  { %v2619_v62 = vpop.eup %2618 }
 0x368   :  { %v1027_v8 = vmul.f32 %v2619_v62, %v2617_v13  ;;  %v1236_v62 = vpop.permute.xlu1 %1235 }
 0x369   :  { %vm1237_vm14 = vcmp.eq.s32.totalorder %v1236_v62, 1 }
 0x36a   :  { %v3163_v58 = vsel %vm1035_vm13, %v1027_v8, %v3122_v3 }
 0x36b   :  { %v1038_v10 = vpack.c.bf16 %v3163_v58, %v3163_v58 }
 0x36d   :  { %2406 = vmatmul.mubr.msk.bf16.vlgmr.msra.gmra.mrb[40].mxu0 %vm67_vm0, %v1038_v10  ;;  %2414 = vmatmul.mubr.msk.bf16.vlgmr.msra.gmra.mrb[40].mxu1 %vm67_vm0, %v1038_v10 }
 0x36e   :  { %2418 = vmatpush3.bf16.msra.mxu0 %v2946_v49  ;;  %2426 = vmatpush3.bf16.msra.mxu1 %v2948_v50 }
 0x36f   :  { %2419 = vmatprep.subr.bf16.mxu0 %v2799_v0  ;;  %2427 = vmatprep.subr.bf16.mxu1 %v2799_v0 }
 0x370   :  { %2421 = vmatprep.mubr.msk.bf16.mxu0 %vm2801_vm6, %v2799_v0  ;;  %2429 = vmatprep.mubr.msk.bf16.mxu1 %vm2801_vm6, %v2799_v0 }
 0x372   :  { %2420 = vmatpush3.bf16.msra.mxu0 %v2953_v55  ;;  %2428 = vmatpush3.bf16.msra.mxu1 %v2957_v56 }
 0x373   :  { %2433 = vmatprep.subr.bf16.mxu0 %v2799_v0  ;;  %2441 = vmatprep.subr.bf16.mxu1 %v2799_v0 }
 0x375   :  { %2422 = vmatmul.mubr.msk.bf16.vlgmr.msra.gmra.mrb[44].mxu0 %vm67_vm0, %v1038_v10  ;;  %2430 = vmatmul.mubr.msk.bf16.vlgmr.msra.gmra.mrb[44].mxu1 %vm67_vm0, %v1038_v10 }
 0x376   :  { %2434 = vmatpush3.bf16.msra.mxu0 %v2914_v34  ;;  %2442 = vmatpush3.bf16.msra.mxu1 %v2916_v35 }
 0x377   :  { %2435 = vmatprep.subr.bf16.mxu0 %v2799_v0  ;;  %2443 = vmatprep.subr.bf16.mxu1 %v2799_v0 }
 0x378   :  { %2437 = vmatprep.mubr.msk.bf16.mxu0 %vm2801_vm6, %v2799_v0  ;;  %2445 = vmatprep.mubr.msk.bf16.mxu1 %vm2801_vm6, %v2799_v0 }
 0x37a   :  { %2436 = vmatpush3.bf16.msra.mxu0 %v2922_v40  ;;  %2444 = vmatpush3.bf16.msra.mxu1 %v2927_v42 }
 0x37b   :  { %2449 = vmatprep.subr.bf16.mxu0 %v2799_v0  ;;  %2457 = vmatprep.subr.bf16.mxu1 %v2799_v0 }
 0x440   :  { %v1076_v1 = vpop.f32.mrb[40].mxu0  ;;  %v1117_v3 = vpop.f32.mrb[40].mxu1 }
 0x441   :  { %v1082_v57 = vadd.f32 %v1076_v1, %v2999_v4  ;;  %v1123_v22 = vadd.f32 %v1117_v3, %v3002_v7  ;;  %v2407_v43 = vpop.f32.mrb[41].mxu0  ;;  %v2415_v30 = vpop.f32.mrb[41].mxu1 }
 0x442   :  { %v1079_v41 = vpop.f32.mrb[42].mxu0  ;;  %v1120_v25 = vpop.f32.mrb[42].mxu1 }
 0x443   :  { %v2118_v38 = vmul.f32 -1.442695, %v1082_v57  ;;  %v2119_v47 = vmul.f32 -1.442695, %v1123_v22  ;;  %v2408_v60 = vpop.f32.mrb[43].mxu0  ;;  %v2416_v32 = vpop.f32.mrb[43].mxu1 }
 0x445   :  { %2620 = vpow2.f32 %v2118_v38 }
 0x446   :  { %2622 = vpow2.f32 %v2119_v47 }
 0x448   :  { %v1158_v63 = vpop.f32.mrb[44].mxu0  ;;  %v1199_v46 = vpop.f32.mrb[44].mxu1 }
 0x449   :  { %v1164_v51 = vadd.f32 %v1158_v63, %v3044_v39  ;;  %v1205_v48 = vadd.f32 %v1199_v46, %v3046_v45  ;;  %v2423_v54 = vpop.f32.mrb[45].mxu0  ;;  %v2431_v4 = vpop.f32.mrb[45].mxu1 }
 0x44a   :  { %v1161_v44 = vpop.f32.mrb[46].mxu0  ;;  %v1202_v7 = vpop.f32.mrb[46].mxu1 }
 0x44b   :  { %v2424_v28 = vpop.f32.mrb[47].mxu0  ;;  %v2432_v29 = vpop.f32.mrb[47].mxu1  ;;  %v2120_v33 = vmul.f32 -1.442695, %v1205_v48 }
 0x44d   :  { %2624 = vpow2.f32 %v2120_v33 }
 0x44e   :  { %2626 = vtanh.f32 %v1164_v51 }
 0x44f   :  { %v2621_v37 = vpop.eup %2620 }
 0x450   :  { %v2623_v31 = vpop.eup %2622  ;;  %v1209_v53 = vadd.f32 1.0, %v2621_v37 }
 0x451   :  { %v1215_v36 = vadd.f32 1.0, %v2623_v31 }
 0x452   :  { %2628 = vrcp.f32 %v1209_v53 }
 0x453   :  { %2630 = vrcp.f32 %v1215_v36 }
 0x457   :  { %v2625_v26 = vpop.eup %2624 }
 0x458   :  { %v2627_v18 = vpop.eup %2626  ;;  %v1222_v5 = vadd.f32 1.0, %v2625_v26 }
 0x45a   :  { %2632 = vrcp.f32 %v1222_v5 }
 0x45c   :  { %v2629_v39 = vpop.eup %2628 }
 0x45d   :  { %v2631_v2 = vpop.eup %2630  ;;  %v1226_v45 = vmul.f32 %v2629_v39, %v2627_v18 }
 0x45e   :  { %v1225_v13 = vmul.f32 %v2631_v2, %v3160_v11 }
 0x460   :  { %v1227_v8 = vadd.f32 %v1226_v45, %v1225_v13  ;;  %v1438_v13 = vpop.permute.xlu0 %1437 }
 0x461   :  { %vm1439_vm15 = vcmp.eq.s32.totalorder %v1438_v13, 1 }
 0x462   :  { %2634 = vtanh.f32 %v1227_v8  ;;  %v3201_v10 = vsel %vm1237_vm14, %v1227_v8, %v3160_v11 }
 0x464   :  { %v2633_v1 = vpop.eup %2632 }
 0x46c   :  { %v2635_v3 = vpop.eup %2634 }
 0x46d   :  { %v1229_v57 = vmul.f32 %v2635_v3, %v2633_v1 }
 0x46f   :  { %v3204_v22 = vsel %vm1237_vm14, %v1229_v57, %v3163_v58 }
 0x470   :  { %v1240_v43 = vpack.c.bf16 %v3204_v22, %v3204_v22 }
 0x472   :  { %2438 = vmatmul.mubr.msk.bf16.vlgmr.msra.gmra.mrb[48].mxu0 %vm67_vm0, %v1240_v43  ;;  %2446 = vmatmul.mubr.msk.bf16.vlgmr.msra.gmra.mrb[48].mxu1 %vm67_vm0, %v1240_v43 }
 0x473   :  { %2450 = vmatpush3.bf16.msra.mxu0 %v2946_v49  ;;  %2458 = vmatpush3.bf16.msra.mxu1 %v2948_v50 }
 0x474   :  { %2451 = vmatprep.subr.bf16.mxu0 %v2799_v0  ;;  %2459 = vmatprep.subr.bf16.mxu1 %v2799_v0 }
 0x475   :  { %2453 = vmatprep.mubr.msk.bf16.mxu0 %vm2801_vm6, %v2799_v0  ;;  %2461 = vmatprep.mubr.msk.bf16.mxu1 %vm2801_vm6, %v2799_v0 }
 0x477   :  { %2452 = vmatpush3.bf16.msra.mxu0 %v2953_v55  ;;  %2460 = vmatpush3.bf16.msra.mxu1 %v2957_v56 }
 0x478   :  { %2465 = vmatprep.subr.bf16.mxu0 %v2799_v0  ;;  %2473 = vmatprep.subr.bf16.mxu1 %v2799_v0 }
 0x47a   :  { %2454 = vmatmul.mubr.msk.bf16.vlgmr.msra.gmra.mrb[52].mxu0 %vm67_vm0, %v1240_v43  ;;  %2462 = vmatmul.mubr.msk.bf16.vlgmr.msra.gmra.mrb[52].mxu1 %vm67_vm0, %v1240_v43 }
 0x47b   :  { %2466 = vmatpush3.bf16.msra.mxu0 %v2914_v34  ;;  %2474 = vmatpush3.bf16.msra.mxu1 %v2916_v35 }
 0x47c   :  { %2467 = vmatprep.subr.bf16.mxu0 %v2799_v0  ;;  %2475 = vmatprep.subr.bf16.mxu1 %v2799_v0 }
 0x47d   :  { %2469 = vmatprep.mubr.msk.bf16.mxu0 %vm2801_vm6, %v2799_v0  ;;  %2477 = vmatprep.mubr.msk.bf16.mxu1 %vm2801_vm6, %v2799_v0 }
 0x47f   :  { %2468 = vmatpush3.bf16.msra.mxu0 %v2922_v40  ;;  %2476 = vmatpush3.bf16.msra.mxu1 %v2927_v42 }
 0x480   :  { %2481 = vmatprep.subr.bf16.mxu0 %v2799_v0  ;;  %2489 = vmatprep.subr.bf16.mxu1 %v2799_v0 }
 0x545   :  { %v1278_v11 = vpop.f32.mrb[48].mxu0  ;;  %v1319_v58 = vpop.f32.mrb[48].mxu1 }
 0x546   :  { %v1284_v30 = vadd.f32 %v1278_v11, %v3017_v16  ;;  %v1325_v41 = vadd.f32 %v1319_v58, %v3020_v19  ;;  %v2439_v25 = vpop.f32.mrb[49].mxu0  ;;  %v2447_v38 = vpop.f32.mrb[49].mxu1 }
 0x547   :  { %v1281_v47 = vpop.f32.mrb[50].mxu0  ;;  %v1322_v60 = vpop.f32.mrb[50].mxu1 }
 0x548   :  { %v2125_v32 = vmul.f32 -1.442695, %v1284_v30  ;;  %v2126_v63 = vmul.f32 -1.442695, %v1325_v41  ;;  %v2440_v46 = vpop.f32.mrb[51].mxu0  ;;  %v2448_v51 = vpop.f32.mrb[51].mxu1 }
 0x54a   :  { %2636 = vpow2.f32 %v2125_v32 }
 0x54b   :  { %2638 = vpow2.f32 %v2126_v63 }
 0x54d   :  { %v1360_v48 = vpop.f32.mrb[52].mxu0  ;;  %v1401_v54 = vpop.f32.mrb[52].mxu1 }
 0x54e   :  { %v1366_v4 = vadd.f32 %v1360_v48, %v3056_v61  ;;  %v1407_v44 = vadd.f32 %v1401_v54, %v3058_v6  ;;  %v2455_v7 = vpop.f32.mrb[53].mxu0  ;;  %v2463_v16 = vpop.f32.mrb[53].mxu1 }
 0x54f   :  { %v1363_v28 = vpop.f32.mrb[54].mxu0  ;;  %v1404_v19 = vpop.f32.mrb[54].mxu1 }
 0x550   :  { %v2456_v29 = vpop.f32.mrb[55].mxu0  ;;  %v2464_v33 = vpop.f32.mrb[55].mxu1  ;;  %v2127_v37 = vmul.f32 -1.442695, %v1407_v44 }
 0x552   :  { %2640 = vpow2.f32 %v2127_v37 }
 0x553   :  { %2642 = vtanh.f32 %v1366_v4 }
 0x554   :  { %v2637_v31 = vpop.eup %2636 }
 0x555   :  { %v2639_v53 = vpop.eup %2638  ;;  %v1411_v36 = vadd.f32 1.0, %v2637_v31 }
 0x556   :  { %v1417_v26 = vadd.f32 1.0, %v2639_v53 }
 0x557   :  { %2644 = vrcp.f32 %v1411_v36 }
 0x558   :  { %2646 = vrcp.f32 %v1417_v26 }
 0x55c   :  { %v2641_v18 = vpop.eup %2640 }
 0x55d   :  { %v2643_v39 = vpop.eup %2642  ;;  %v1424_v45 = vadd.f32 1.0, %v2641_v18 }
 0x55f   :  { %2648 = vrcp.f32 %v1424_v45 }
 0x561   :  { %v2645_v61 = vpop.eup %2644 }
 0x562   :  { %v2647_v2 = vpop.eup %2646  ;;  %v1428_v6 = vmul.f32 %v2645_v61, %v2643_v39  ;;  %v1640_v61 = vpop.permute.xlu1 %1639 }
 0x563   :  { %v1427_v5 = vmul.f32 %v2647_v2, %v3201_v10  ;;  %vm1641_vm1 = vcmp.eq.s32.totalorder %v1640_v61, 1 }
 0x565   :  { %v1429_v62 = vadd.f32 %v1428_v6, %v1427_v5 }
 0x567   :  { %2650 = vtanh.f32 %v1429_v62  ;;  %v3242_v8 = vsel %vm1439_vm15, %v1429_v62, %v3201_v10 }
 0x569   :  { %v2649_v1 = vpop.eup %2648 }
 0x571   :  { %v2651_v3 = vpop.eup %2650 }
 0x572   :  { %v1431_v57 = vmul.f32 %v2651_v3, %v2649_v1 }
 0x574   :  { %v3245_v43 = vsel %vm1439_vm15, %v1431_v57, %v3204_v22 }
 0x575   :  { %v1442_v11 = vpack.c.bf16 %v3245_v43, %v3245_v43 }
 0x577   :  { %2470 = vmatmul.mubr.msk.bf16.vlgmr.msra.gmra.mrb[56].mxu0 %vm67_vm0, %v1442_v11  ;;  %2478 = vmatmul.mubr.msk.bf16.vlgmr.msra.gmra.mrb[56].mxu1 %vm67_vm0, %v1442_v11 }
 0x578   :  { %2482 = vmatpush3.bf16.msra.mxu0 %v2946_v49  ;;  %2490 = vmatpush3.bf16.msra.mxu1 %v2948_v50 }
 0x579   :  { %2483 = vmatprep.subr.bf16.mxu0 %v2799_v0  ;;  %2491 = vmatprep.subr.bf16.mxu1 %v2799_v0 }
 0x57a   :  { %2485 = vmatprep.mubr.msk.bf16.mxu0 %vm2801_vm6, %v2799_v0  ;;  %2493 = vmatprep.mubr.msk.bf16.mxu1 %vm2801_vm6, %v2799_v0 }
 0x57c   :  { %2484 = vmatpush3.bf16.msra.mxu0 %v2953_v55  ;;  %2492 = vmatpush3.bf16.msra.mxu1 %v2957_v56 }
 0x57d   :  { %2497 = vmatprep.subr.bf16.mxu0 %v2799_v0  ;;  %2505 = vmatprep.subr.bf16.mxu1 %v2799_v0 }
 0x57f   :  { %2486 = vmatmul.mubr.msk.bf16.vlgmr.msra.gmra.mrb[60].mxu0 %vm67_vm0, %v1442_v11  ;;  %2494 = vmatmul.mubr.msk.bf16.vlgmr.msra.gmra.mrb[60].mxu1 %vm67_vm0, %v1442_v11 }
 0x580   :  { %2498 = vmatpush3.bf16.msra.mxu0 %v2914_v34  ;;  %2506 = vmatpush3.bf16.msra.mxu1 %v2916_v35 }
 0x581   :  { %2499 = vmatprep.subr.bf16.mxu0 %v2799_v0  ;;  %2507 = vmatprep.subr.bf16.mxu1 %v2799_v0 }
 0x582   :  { %2501 = vmatprep.mubr.msk.bf16.mxu0 %vm2801_vm6, %v2799_v0  ;;  %2509 = vmatprep.mubr.msk.bf16.mxu1 %vm2801_vm6, %v2799_v0 }
 0x584   :  { %2500 = vmatpush3.bf16.msra.mxu0 %v2922_v40  ;;  %2508 = vmatpush3.bf16.msra.mxu1 %v2927_v42 }
 0x585   :  { %2513 = vmatprep.subr.bf16.mxu0 %v2799_v0  ;;  %2521 = vmatprep.subr.bf16.mxu1 %v2799_v0 }
 0x64a   :  { %v1480_v10 = vpop.f32.mrb[56].mxu0  ;;  %v1521_v22 = vpop.f32.mrb[56].mxu1 }
 0x64b   :  { %v1486_v58 = vadd.f32 %v1480_v10, %v3029_v24  ;;  %v1527_v30 = vadd.f32 %v1521_v22, %v3032_v27  ;;  %v2471_v41 = vpop.f32.mrb[57].mxu0  ;;  %v2479_v25 = vpop.f32.mrb[57].mxu1 }
 0x64c   :  { %v1483_v38 = vpop.f32.mrb[58].mxu0  ;;  %v1524_v47 = vpop.f32.mrb[58].mxu1 }
 0x64d   :  { %v2132_v60 = vmul.f32 -1.442695, %v1486_v58  ;;  %v2133_v32 = vmul.f32 -1.442695, %v1527_v30  ;;  %v2472_v63 = vpop.f32.mrb[59].mxu0  ;;  %v2480_v46 = vpop.f32.mrb[59].mxu1 }
 0x64f   :  { %2652 = vpow2.f32 %v2132_v60 }
 0x650   :  { %2654 = vpow2.f32 %v2133_v32 }
 0x652   :  { %v1562_v51 = vpop.f32.mrb[60].mxu0  ;;  %v1603_v48 = vpop.f32.mrb[60].mxu1 }
 0x653   :  { %v1568_v54 = vadd.f32 %v1562_v51, %v3064_v17  ;;  %v1609_v4 = vadd.f32 %v1603_v48, %v3066_v21  ;;  %v2487_v44 = vpop.f32.mrb[61].mxu0  ;;  %v2495_v24 = vpop.f32.mrb[61].mxu1 }
 0x654   :  { %v1565_v7 = vpop.f32.mrb[62].mxu0  ;;  %v1606_v27 = vpop.f32.mrb[62].mxu1 }
 0x655   :  { %v2488_v16 = vpop.f32.mrb[63].mxu0  ;;  %v2496_v28 = vpop.f32.mrb[63].mxu1  ;;  %v2134_v19 = vmul.f32 -1.442695, %v1609_v4 }
 0x656   :  { %v1842_v16 = vpop.permute.xlu0 %1841 }
 0x657   :  { %2656 = vpow2.f32 %v2134_v19  ;;  %vm1843_vm2 = vcmp.eq.s32.totalorder %v1842_v16, 1 }
 0x658   :  { %2658 = vtanh.f32 %v1568_v54 }
 0x659   :  { %v2653_v29 = vpop.eup %2652 }
 0x65a   :  { %v2655_v33 = vpop.eup %2654  ;;  %v1613_v37 = vadd.f32 1.0, %v2653_v29 }
 0x65b   :  { %v1619_v31 = vadd.f32 1.0, %v2655_v33 }
 0x65c   :  { %2660 = vrcp.f32 %v1613_v37 }
 0x65d   :  { %2662 = vrcp.f32 %v1619_v31 }
 0x661   :  { %v2657_v53 = vpop.eup %2656 }
 0x662   :  { %v2659_v36 = vpop.eup %2658  ;;  %v1626_v18 = vadd.f32 1.0, %v2657_v53 }
 0x664   :  { %2664 = vrcp.f32 %v1626_v18 }
 0x666   :  { %v2661_v17 = vpop.eup %2660 }
 0x667   :  { %v2663_v26 = vpop.eup %2662  ;;  %v1630_v21 = vmul.f32 %v2661_v17, %v2659_v36 }
 0x668   :  { %v1629_v39 = vmul.f32 %v2663_v26, %v3242_v8 }
 0x66a   :  { %v1631_v2 = vadd.f32 %v1630_v21, %v1629_v39 }
 0x66c   :  { %2666 = vtanh.f32 %v1631_v2  ;;  %v3283_v6 = vsel %vm1641_vm1, %v1631_v2, %v3242_v8 }
 0x66e   :  { %v2665_v45 = vpop.eup %2664 }
 0x676   :  { %v2667_v5 = vpop.eup %2666 }
 0x677   :  { %v1633_v13 = vmul.f32 %v2667_v5, %v2665_v45 }
 0x679   :  { %v3286_v62 = vsel %vm1641_vm1, %v1633_v13, %v3245_v43 }
 0x67a   :  { %v1644_v1 = vpack.c.bf16 %v3286_v62, %v3286_v62 }
 0x67c   :  { %2502 = vmatmul.mubr.msk.bf16.vlgmr.msra.gmra.mrb[64].mxu0 %vm67_vm0, %v1644_v1  ;;  %2510 = vmatmul.mubr.msk.bf16.vlgmr.msra.gmra.mrb[64].mxu1 %vm67_vm0, %v1644_v1 }
 0x67d   :  { %2514 = vmatpush3.bf16.msra.mxu0 %v2946_v49  ;;  %2522 = vmatpush3.bf16.msra.mxu1 %v2948_v50 }
 0x67e   :  { %2515 = vmatprep.subr.bf16.mxu0 %v2799_v0  ;;  %2523 = vmatprep.subr.bf16.mxu1 %v2799_v0 }
 0x67f   :  { %2517 = vmatprep.mubr.msk.bf16.mxu0 %vm2801_vm6, %v2799_v0  ;;  %2525 = vmatprep.mubr.msk.bf16.mxu1 %vm2801_vm6, %v2799_v0 }
 0x681   :  { %2516 = vmatpush3.bf16.msra.mxu0 %v2953_v55  ;;  %2524 = vmatpush3.bf16.msra.mxu1 %v2957_v56 }
 0x682   :  { %2529 = vmatprep.subr.bf16.mxu0 %v2799_v0  ;;  %2537 = vmatprep.subr.bf16.mxu1 %v2799_v0 }
 0x684   :  { %2518 = vmatmul.mubr.msk.bf16.vlgmr.msra.gmra.mrb[68].mxu0 %vm67_vm0, %v1644_v1  ;;  %2526 = vmatmul.mubr.msk.bf16.vlgmr.msra.gmra.mrb[68].mxu1 %vm67_vm0, %v1644_v1 }
 0x685   :  { %2530 = vmatpush3.bf16.msra.mxu0 %v2914_v34  ;;  %2538 = vmatpush3.bf16.msra.mxu1 %v2916_v35 }
 0x686   :  { %2531 = vmatprep.subr.bf16.mxu0 %v2799_v0  ;;  %2539 = vmatprep.subr.bf16.mxu1 %v2799_v0 }
 0x687   :  { %2533 = vmatprep.mubr.msk.bf16.mxu0 %vm2801_vm6, %v2799_v0  ;;  %2541 = vmatprep.mubr.msk.bf16.mxu1 %vm2801_vm6, %v2799_v0 }
 0x689   :  { %2532 = vmatpush3.bf16.msra.mxu0 %v2922_v40  ;;  %2540 = vmatpush3.bf16.msra.mxu1 %v2927_v42 }
 0x68a   :  { %2545 = vmatprep.subr.bf16.mxu0 %v2799_v0  ;;  %2553 = vmatprep.subr.bf16.mxu1 %v2799_v0 }
 0x74f   :  { %v1682_v34 = vpop.f32.mrb[64].mxu0  ;;  %v1723_v35 = vpop.f32.mrb[64].mxu1 }
 0x750   :  { %v1688_v8 = vadd.f32 %v1682_v34, %v3011_v12  ;;  %v1729_v3 = vadd.f32 %v1723_v35, %v3014_v15  ;;  %v2503_v57 = vpop.f32.mrb[65].mxu0  ;;  %v2511_v43 = vpop.f32.mrb[65].mxu1 }
 0x751   :  { %v1685_v11 = vpop.f32.mrb[66].mxu0  ;;  %v1726_v10 = vpop.f32.mrb[66].mxu1 }
 0x752   :  { %v2139_v22 = vmul.f32 -1.442695, %v1688_v8  ;;  %v2140_v58 = vmul.f32 -1.442695, %v1729_v3  ;;  %v2504_v30 = vpop.f32.mrb[67].mxu0  ;;  %v2512_v40 = vpop.f32.mrb[67].mxu1 }
 0x753   :  { %v2044_v40 = vpop.permute.xlu1 %2043 }
 0x754   :  { %2668 = vpow2.f32 %v2139_v22  ;;  %vm2045_vm3 = vcmp.eq.s32.totalorder %v2044_v40, 1 }
 0x755   :  { %2670 = vpow2.f32 %v2140_v58 }
 0x757   :  { %v1764_v42 = vpop.f32.mrb[68].mxu0  ;;  %v1805_v41 = vpop.f32.mrb[68].mxu1 }
 0x758   :  { %v1770_v25 = vadd.f32 %v1764_v42, %v3052_v52  ;;  %v1811_v38 = vadd.f32 %v1805_v41, %v3054_v59  ;;  %v2519_v47 = vpop.f32.mrb[69].mxu0  ;;  %v2527_v12 = vpop.f32.mrb[69].mxu1 }
 0x759   :  { %v1767_v60 = vpop.f32.mrb[70].mxu0  ;;  %v1808_v15 = vpop.f32.mrb[70].mxu1 }
 0x75a   :  { %v2520_v32 = vpop.f32.mrb[71].mxu0  ;;  %v2528_v63 = vpop.f32.mrb[71].mxu1  ;;  %v2141_v46 = vmul.f32 -1.442695, %v1811_v38 }
 0x75c   :  { %2672 = vpow2.f32 %v2141_v46 }
 0x75d   :  { %2674 = vtanh.f32 %v1770_v25 }
 0x75e   :  { %v2669_v51 = vpop.eup %2668 }
 0x75f   :  { %v2671_v48 = vpop.eup %2670  ;;  %v1815_v54 = vadd.f32 1.0, %v2669_v51 }
 0x760   :  { %v1821_v4 = vadd.f32 1.0, %v2671_v48 }
 0x761   :  { %2676 = vrcp.f32 %v1815_v54 }
 0x762   :  { %2678 = vrcp.f32 %v1821_v4 }
 0x766   :  { %v2673_v44 = vpop.eup %2672 }
 0x767   :  { %v2675_v24 = vpop.eup %2674  ;;  %v1828_v27 = vadd.f32 1.0, %v2673_v44 }
 0x769   :  { %2680 = vrcp.f32 %v1828_v27 }
 0x76b   :  { %v2677_v52 = vpop.eup %2676 }
 0x76c   :  { %v2679_v7 = vpop.eup %2678  ;;  %v1832_v59 = vmul.f32 %v2677_v52, %v2675_v24 }
 0x76d   :  { %v1831_v28 = vmul.f32 %v2679_v7, %v3283_v6 }
 0x76f   :  { %v1833_v19 = vadd.f32 %v1832_v59, %v1831_v28 }
 0x771   :  { %2682 = vtanh.f32 %v1833_v19  ;;  %v3324_v29 = vsel %vm1843_vm2, %v1833_v19, %v3283_v6 }
 0x773   :  { %v2681_v33 = vpop.eup %2680 }
 0x77b   :  { %v2683_v37 = vpop.eup %2682 }
 0x77c   :  { %v1835_v31 = vmul.f32 %v2683_v37, %v2681_v33 }
 0x77e   :  { %v3327_v53 = vsel %vm1843_vm2, %v1835_v31, %v3286_v62 }
 0x77f   :  { %v1846_v36 = vpack.c.bf16 %v3327_v53, %v3327_v53 }
 0x781   :  { %2534 = vmatmul.mubr.msk.bf16.vlgmr.msra.gmra.mrb[72].mxu0 %vm67_vm0, %v1846_v36  ;;  %2542 = vmatmul.mubr.msk.bf16.vlgmr.msra.gmra.mrb[72].mxu1 %vm67_vm0, %v1846_v36 }
 0x782   :  { %2546 = vmatpush3.bf16.msra.mxu0 %v2946_v49  ;;  %2554 = vmatpush3.bf16.msra.mxu1 %v2948_v50 }
 0x783   :  { %2547 = vmatprep.subr.bf16.mxu0 %v2799_v0  ;;  %2555 = vmatprep.subr.bf16.mxu1 %v2799_v0 }
 0x784   :  { %2549 = vmatprep.mubr.msk.bf16.mxu0 %vm2801_vm6, %v2799_v0  ;;  %2557 = vmatprep.mubr.msk.bf16.mxu1 %vm2801_vm6, %v2799_v0 }
 0x786   :  { %2548 = vmatpush3.bf16.msra.mxu0 %v2953_v55  ;;  %2556 = vmatpush3.bf16.msra.mxu1 %v2957_v56 }
 0x789   :  { %2550 = vmatmul.mubr.msk.bf16.vlgmr.msra.gmra.mrb[76].mxu0 %vm67_vm0, %v1846_v36  ;;  %2558 = vmatmul.mubr.msk.bf16.vlgmr.msra.gmra.mrb[76].mxu1 %vm67_vm0, %v1846_v36 }
 0x854   :  { %v1884_v49 = vpop.f32.mrb[72].mxu0  ;;  %v1925_v50 = vpop.f32.mrb[72].mxu1 }
 0x855   :  { %v1890_v17 = vadd.f32 %v1884_v49, %v3023_v20  ;;  %v1931_v26 = vadd.f32 %v1925_v50, %v3026_v23  ;;  %v2535_v21 = vpop.f32.mrb[73].mxu0  ;;  %v2543_v18 = vpop.f32.mrb[73].mxu1 }
 0x856   :  { %v1887_v39 = vpop.f32.mrb[74].mxu0  ;;  %v1928_v61 = vpop.f32.mrb[74].mxu1 }
 0x857   :  { %v2146_v2 = vmul.f32 -1.442695, %v1890_v17  ;;  %v2147_v0 = vmul.f32 -1.442695, %v1931_v26  ;;  %v2536_v6 = vpop.f32.mrb[75].mxu0  ;;  %v2544_v55 = vpop.f32.mrb[75].mxu1 }
 0x859   :  { %2684 = vpow2.f32 %v2146_v2 }
 0x85a   :  { %2686 = vpow2.f32 %v2147_v0 }
 0x85c   :  { %v1966_v56 = vpop.f32.mrb[76].mxu0  ;;  %v2007_v45 = vpop.f32.mrb[76].mxu1 }
 0x85d   :  { %v1972_v5 = vadd.f32 %v1966_v56, %v3060_v9  ;;  %v2013_v13 = vadd.f32 %v2007_v45, %v3062_v14  ;;  %v2551_v62 = vpop.f32.mrb[77].mxu0  ;;  %v2559_v20 = vpop.f32.mrb[77].mxu1 }
 0x85e   :  { %v1969_v1 = vpop.f32.mrb[78].mxu0  ;;  %v2010_v23 = vpop.f32.mrb[78].mxu1 }
 0x85f   :  { %v2552_v34 = vpop.f32.mrb[79].mxu0  ;;  %v2560_v35 = vpop.f32.mrb[79].mxu1  ;;  %v2148_v8 = vmul.f32 -1.442695, %v2013_v13 }
 0x861   :  { %2688 = vpow2.f32 %v2148_v8 }
 0x862   :  { %2690 = vtanh.f32 %v1972_v5 }
 0x863   :  { %v2685_v3 = vpop.eup %2684 }
 0x864   :  { %v2687_v57 = vpop.eup %2686  ;;  %v2017_v43 = vadd.f32 1.0, %v2685_v3 }
 0x865   :  { %v2023_v11 = vadd.f32 1.0, %v2687_v57 }
 0x866   :  { %2692 = vrcp.f32 %v2017_v43 }
 0x867   :  { %2694 = vrcp.f32 %v2023_v11 }
 0x86b   :  { %v2689_v10 = vpop.eup %2688 }
 0x86c   :  { %v2691_v22 = vpop.eup %2690  ;;  %v2030_v30 = vadd.f32 1.0, %v2689_v10 }
 0x86e   :  { %2696 = vrcp.f32 %v2030_v30 }
 0x870   :  { %v2693_v9 = vpop.eup %2692 }
 0x871   :  { %v2695_v58 = vpop.eup %2694  ;;  %v2034_v14 = vmul.f32 %v2693_v9, %v2691_v22 }
 0x872   :  { %v2033_v42 = vmul.f32 %v2695_v58, %v3324_v29 }
 0x874   :  { %v2035_v41 = vadd.f32 %v2034_v14, %v2033_v42 }
 0x876   :  { %2698 = vtanh.f32 %v2035_v41  ;;  %v2047_v25 = vsel %vm2045_vm3, %v2035_v41, %v3324_v29 }
 0x877   :  { %2049 = vst.msk [vmem:[#allocation3] sm:$0xff] %vm67_vm0, %v2047_v25 }
 0x878   :  { %v2697_v38 = vpop.eup %2696 }
 0x880   :  { %v2699_v47 = vpop.eup %2698 }
 0x881   :  { %v2037_v12 = vmul.f32 %v2699_v47, %v2697_v38 }
 0x883   :  { %v2046_v60 = vsel %vm2045_vm3, %v2037_v12, %v3327_v53 }
 0x884   :  { %2048 = vst.msk [vmem:[#allocation2] sm:$0xff] %vm67_vm0, %v2046_v60  ;;  %2053 = vst.msk [vmem:[#allocation10] sm:$0xff] %vm67_vm0, %v2046_v60 }
 0x885   :  { %2777 = shalt.err (!%p2774_p0)
}
 0x886   :  { %s2778_s16 = scalar_lea.hbm %s3372_s5, 128 }
 0x887   :  { %p2779_p1 = scmp.ne.s32.totalorder %s3372_s5, %s2778_s16  ;;  %p2782_p2 = scmp.lt.u32.totalorder %s2778_s16, %s3372_s5 }
 0x889   :  { %p2784_p3 = pnand %p2782_p2, %p2779_p1 }
 0x88b   :  { %2787 = shalt.err (!%p2784_p3)
}
 0x88c   :  { %2063 = dma.vmem_to_hbm [thread:$0]  %s2061_s12, 128, %s3372_s5, [#allocation6]  }
 0x88d   :  { %2792 = dma.done.wait [#allocation6], 128  }
 0x88e   :  { %2793 = vsyncadd [#allocation6], 4294967168 }
 0x88f   :  { %2067 = vsyncpa [#allocation5], 1 }
 0x890   :  { %2068 = vsyncpa [#allocation8], 1 }
 0x891   :  { %2069 = vsyncpa [#allocation6], 1 }

</bundles_post_ra>
